<compile_context>
chip_gen: v7x
topology: tpu7x:2x2x1
jax: 0.10.0
libtpu: 0.0.40
codegen_flags: <defaults>
</compile_context>

<pallas_src>
import functools

import jax
import jax.numpy as jnp
from jax import lax
from jax.experimental import pallas as pl
from jax.experimental.pallas import tpu as pltpu

_LANE = 128
_SUBLANE = 8
# Embedding tables up to this many bytes stay resident in VMEM with the gather
# done in-kernel; larger tables fall back to a wrapper-side pre-gather.
_TABLE_VMEM_BUDGET = 8 * 1024 * 1024


def _round_up(n, m):
    return ((n + m - 1) // m) * m


def _lstm_kernel(ids_ref, table_ref, wih_ref, whh_ref, b_ref, wout_ref,
                 bout_ref, ylab_ref, logits_ref, loss_ref, xg_ref, xp_ref, *,
                 seq, batch, hidden, valid_rows, valid_labels):
    """Whole LSTMClassifier forward: embed-gather -> LSTM -> head -> BCE loss.

    ids_ref:    (S*B,)    i32 SMEM   flat embedding row ids (kernel-row order)
    table_ref:  (V, E)    f32 VMEM   embedding table (or pre-gathered rows)
    wih_ref:    (E, 4H)   bf16       input->gate weights, gate order i,f,o,g
    whh_ref:    (H, 4H)   bf16       hidden->gate weights, gate order i,f,o,g
    b_ref:      (1, 4H)   f32        bias_ih + bias_hh, gate order i,f,o,g
    wout_ref:   (H, L)    bf16       hidden2label weight (lane-padded)
    bout_ref:   (1, L)    f32        hidden2label bias (lane-padded)
    ylab_ref:   (B, L)    f32        labels (zero-padded)
    logits_ref: (B, L)    f32 out    lane-dense logits
    loss_ref:   (1, 1)    f32 out    BCEWithLogits mean loss
    xg_ref:     (S*B, E)  f32 VMEM   scratch: gathered embeddings
    xp_ref:     (S*B, 4H) f32 VMEM   scratch: hoisted x @ W_ih + b
    """
    n_rows = seq * batch

    # --- Phase 0: embedding gather (dynamic row reads from the resident table).
    @pl.loop(0, n_rows)
    def _(r):
        idx = ids_ref[r]
        xg_ref[pl.ds(r, 1), :] = table_ref[pl.ds(idx, 1), :]

    # --- Phase 1 (hoisted out of the recurrence): every timestep's
    # x @ W_ih + b as ONE (S*B, E) @ (E, 4H) matmul, f32 accumulation.
    xp_ref[...] = (
        jnp.dot(xg_ref[...].astype(jnp.bfloat16), wih_ref[...],
                preferred_element_type=jnp.float32)
        + b_ref[...]
    )

    # --- Phase 2: serial recurrence.  Only h @ W_hh sits on the critical
    # path; gate slabs come from the xp scratch via aligned dynamic slices.
    # TODO(synk): W_hh could be pinned in MXU weight registers across the
    # recurrence via pltpu.matmul_push_rhs/_acc_lhs/_pop (generation-specific
    # N-tiling: 4x128 on v5e, 2x256 on v6e/v7x); kept as a VMEM-fed jnp.dot
    # here for portability.
    def step(t, carry):
        h, c = carry
        row0 = pl.multiple_of(t * batch, batch)
        gates = xp_ref[pl.ds(row0, batch), :] + jnp.dot(
            h.astype(jnp.bfloat16), whh_ref[...],
            preferred_element_type=jnp.float32)
        # Gate order (i, f, o | g): the three sigmoids are one contiguous slab
        # and sigmoid(x) = 0.5 * tanh(0.5 * x) + 0.5 is a single EUP op.
        sig = 0.5 * jnp.tanh(0.5 * gates[:, :3 * hidden]) + 0.5
        g_t = jnp.tanh(gates[:, 3 * hidden:])
        c_new = sig[:, hidden:2 * hidden] * c + sig[:, :hidden] * g_t
        h_new = sig[:, 2 * hidden:3 * hidden] * jnp.tanh(c_new)
        return h_new, c_new

    h0 = jnp.zeros((batch, hidden), jnp.float32)   # matches init_hidden() zeros
    c0 = jnp.zeros((batch, hidden), jnp.float32)
    h, _ = lax.fori_loop(0, seq, step, (h0, c0), unroll=True)

    # --- Phase 3: hidden2label on lstm_out[-1]; lane-dense (L=128) store.
    logits = (
        jnp.dot(h.astype(jnp.bfloat16), wout_ref[...],
                preferred_element_type=jnp.float32)
        + bout_ref[...]
    )
    logits_ref[...] = logits

    # --- Phase 4: BCEWithLogitsLoss (mean) over the valid (rows, labels) block.
    y = ylab_ref[...]
    per = (jnp.maximum(logits, 0.0) - logits * y
           + jnp.log(1.0 + jnp.exp(-jnp.abs(logits))))
    row_ok = lax.broadcasted_iota(jnp.int32, per.shape, 0) < valid_rows
    col_ok = lax.broadcasted_iota(jnp.int32, per.shape, 1) < valid_labels
    per = jnp.where(row_ok & col_ok, per, 0.0)
    total = jnp.sum(jnp.sum(per, axis=1, keepdims=True), axis=0, keepdims=True)
    loss_ref[...] = total * (1.0 / float(valid_rows * valid_labels))


def _prep_gate_matrix(w_t, rows, rows_pad, h, hp, dtype):
    """w_t: (rows, 4h), PyTorch gate column order (i, f, g, o).
    Returns (rows_pad, 4*hp) in kernel gate order (i, f, o, g), zero-padded."""
    i_w, f_w, g_w, o_w = jnp.split(w_t, 4, axis=1)
    out = jnp.zeros((rows_pad, 4 * hp), dtype)
    for k, blk in enumerate((i_w, f_w, o_w, g_w)):
        out = out.at[:rows, k * hp:k * hp + h].set(blk.astype(dtype))
    return out


@functools.partial(jax.jit, static_argnames=("num_labels",))
def lstm_classifier_forward(input_ids, embed_table, w_ih, w_hh, b_ih, b_hh,
                            w_out, b_out, labels=None, attention_mask=None, *,
                            num_labels):
    """Glue: layout prep + padding, then the single fused Pallas kernel.

    Weights are in native PyTorch layouts: w_ih (4H, E), w_hh (4H, H),
    w_out (num_labels, H).  attention_mask is accepted but unused, exactly as
    in the reference module.
    """
    del attention_mask
    batch, seq = input_ids.shape          # module assumes batch == batch_size
    vocab, embed_dim = embed_table.shape
    hidden_dim = w_hh.shape[1]

    bp = _round_up(max(batch, 1), _SUBLANE)
    ep = _round_up(embed_dim, _LANE)
    hp = _round_up(hidden_dim, _LANE)
    lp = _round_up(num_labels, _LANE)
    vp = _round_up(vocab, _SUBLANE)

    # PyTorch's x.view(seq, batch, -1) is a RAW reshape of the (batch, seq, E)
    # embedding output, so kernel row r uses input_ids.reshape(-1)[r].
    # Regroup as (seq, batch) timestep slabs and pad the batch axis so every
    # slab is sublane-aligned (padded rows gather table row 0, harmless).
    ids_view = input_ids.reshape(-1).astype(jnp.int32).reshape(seq, batch)
    ids_flat = jnp.zeros((seq, bp), jnp.int32).at[:, :batch].set(
        ids_view).reshape(seq * bp)

    table_bytes = vp * ep * 4
    if table_bytes <= _TABLE_VMEM_BUDGET:
        # In-kernel gather from the resident table.
        table = jnp.zeros((vp, ep), jnp.float32)
        table = table.at[:vocab, :embed_dim].set(embed_table.astype(jnp.float32))
        ids_arg = ids_flat
    else:
        # Fallback for huge vocab: pre-gather in the wrapper; the kernel's
        # gather loop then degenerates to an identity row copy.
        gathered = embed_table.astype(jnp.float32)[ids_flat]       # (S*Bp, E)
        table = jnp.zeros((seq * bp, ep), jnp.float32)
        table = table.at[:, :embed_dim].set(gathered)
        ids_arg = jnp.arange(seq * bp, dtype=jnp.int32)

    # Weights: transpose from PyTorch layout, permute gates (i,f,g,o)->(i,f,o,g),
    # zero-pad to aligned shapes (padded hidden/embed lanes stay exactly zero
    # through the recurrence, so results are unchanged).
    wih_k = _prep_gate_matrix(w_ih.T, embed_dim, ep, hidden_dim, hp, jnp.bfloat16)
    whh_k = _prep_gate_matrix(w_hh.T, hidden_dim, hp, hidden_dim, hp, jnp.bfloat16)
    b_k = _prep_gate_matrix((b_ih + b_hh).reshape(1, -1), 1, 1, hidden_dim, hp,
                            jnp.float32)
    wout_k = jnp.zeros((hp, lp), jnp.bfloat16)
    wout_k = wout_k.at[:hidden_dim, :num_labels].set(w_out.T.astype(jnp.bfloat16))
    bout_k = jnp.zeros((1, lp), jnp.float32).at[:, :num_labels].set(
        b_out.reshape(1, -1).astype(jnp.float32))

    y = labels if labels is not None else jnp.zeros((batch, num_labels),
                                                    jnp.float32)
    ylab_k = jnp.zeros((bp, lp), jnp.float32).at[:batch, :num_labels].set(
        y.astype(jnp.float32))

    kernel = functools.partial(_lstm_kernel, seq=seq, batch=bp, hidden=hp,
                               valid_rows=batch, valid_labels=num_labels)

    # TODO(synk): for v7x (2 TensorCores/chip) add a leading batch-tile grid
    # axis with dimension_semantics=("parallel",) once batch grows; at batch=8
    # a grid only adds overhead.  Also chunk the xp scratch over seq (or store
    # it bf16) before scaling toward v7x's 64 MiB physical VMEM.
    logits_pad, loss11 = pl.pallas_call(
        kernel,
        out_shape=(jax.ShapeDtypeStruct((bp, lp), jnp.float32),
                   jax.ShapeDtypeStruct((1, 1), jnp.float32)),
        in_specs=[
            pl.BlockSpec(memory_space=pltpu.MemorySpace.SMEM),   # ids
            pl.BlockSpec(memory_space=pltpu.MemorySpace.VMEM),   # embed table
            pl.BlockSpec(memory_space=pltpu.MemorySpace.VMEM),   # W_ih
            pl.BlockSpec(memory_space=pltpu.MemorySpace.VMEM),   # W_hh
            pl.BlockSpec(memory_space=pltpu.MemorySpace.VMEM),   # bias
            pl.BlockSpec(memory_space=pltpu.MemorySpace.VMEM),   # W_out
            pl.BlockSpec(memory_space=pltpu.MemorySpace.VMEM),   # b_out
            pl.BlockSpec(memory_space=pltpu.MemorySpace.VMEM),   # labels
        ],
        out_specs=(pl.BlockSpec(memory_space=pltpu.MemorySpace.VMEM),
                   pl.BlockSpec(memory_space=pltpu.MemorySpace.VMEM)),
        scratch_shapes=[
            pltpu.VMEM((seq * bp, ep), jnp.float32),       # gathered x
            pltpu.VMEM((seq * bp, 4 * hp), jnp.float32),   # x @ W_ih + b
        ],
        compiler_params=pltpu.CompilerParams(
            # ~1.5 MiB resident at demo shapes; explicit limit keeps the same
            # resident-everything layout compiling on v5e (16 MiB default
            # scoped VMEM) if shapes grow moderately.
            vmem_limit_bytes=32 * 1024 * 1024),
    )(ids_arg, table, wih_k, whh_k, b_k, wout_k, bout_k, ylab_k)

    out = {"logits": logits_pad[:batch, :num_labels]}
    if labels is not None:
        out["loss"] = loss11[0, 0]
    return out


def _init_params(key, vocab_size, embed_dim, hidden_dim, num_labels):
    """Parameters in native PyTorch layouts (gate order i, f, g, o)."""
    ks = jax.random.split(key, 7)
    s = hidden_dim ** -0.5
    embed_table = jax.random.normal(ks[0], (vocab_size, embed_dim),
                                    jnp.float32) * 0.02
    w_ih = jax.random.uniform(ks[1], (4 * hidden_dim, embed_dim), jnp.float32, -s, s)
    w_hh = jax.random.uniform(ks[2], (4 * hidden_dim, hidden_dim), jnp.float32, -s, s)
    b_ih = jax.random.uniform(ks[3], (4 * hidden_dim,), jnp.float32, -s, s)
    b_hh = jax.random.uniform(ks[4], (4 * hidden_dim,), jnp.float32, -s, s)
    w_out = jax.random.uniform(ks[5], (num_labels, hidden_dim), jnp.float32, -s, s)
    b_out = jax.random.uniform(ks[6], (num_labels,), jnp.float32, -s, s)
    return embed_table, w_ih, w_hh, b_ih, b_hh, w_out, b_out


if __name__ == "__main__":
    # Small shapes consistent with the module's forward.
    num_labels = 24
    batch = 8
    seq = 8
    embed_dim = 128
    hidden_dim = 128
    vocab_size = 1000

    key = jax.random.PRNGKey(0)
    k_ids, k_lab, k_par = jax.random.split(key, 3)

    input_ids = jax.random.randint(k_ids, (batch, seq), 0, vocab_size, jnp.int32)
    labels = jax.random.bernoulli(k_lab, 0.5, (batch, num_labels)).astype(jnp.float32)
    params = _init_params(k_par, vocab_size, embed_dim, hidden_dim, num_labels)

    out = lstm_classifier_forward(input_ids, *params, labels=labels,
                                  num_labels=num_labels)
    jax.block_until_ready(out["logits"])
    jax.block_until_ready(out["loss"])
    assert out["logits"].shape == (batch, num_labels)
    assert out["loss"].shape == ()
    # TODO(synk): nn.LSTM dropout=0.1 is inactive for a 1-layer LSTM / eval
    # mode, so it is intentionally not modeled.
    print("KERNEL_OK")
</pallas_src>

<mosaic_0001>
module attributes {stable_mosaic.version = 11 : i64} {
  func.func @_lstm_kernel(%arg0: memref<64xi32, #tpu.memory_space<smem>>, %arg1: memref<1000x128xf32, #tpu.memory_space<vmem>>, %arg2: memref<128x512xbf16, #tpu.memory_space<vmem>>, %arg3: memref<128x512xbf16, #tpu.memory_space<vmem>>, %arg4: memref<1x512xf32, #tpu.memory_space<vmem>>, %arg5: memref<128x128xbf16, #tpu.memory_space<vmem>>, %arg6: memref<1x128xf32, #tpu.memory_space<vmem>>, %arg7: memref<8x128xf32, #tpu.memory_space<vmem>>, %arg8: memref<8x128xf32, #tpu.memory_space<vmem>>, %arg9: memref<1x1xf32, #tpu.memory_space<vmem>>, %arg10: memref<64x128xf32, #tpu.memory_space<vmem>>, %arg11: memref<64x512xf32, #tpu.memory_space<vmem>>) attributes {dimension_semantics = [], scalar_prefetch = 0 : i64, scratch_operands = 2 : i64, tpu.core_type = #tpu.core_type<tc>} {
    %c0_i32 = arith.constant 0 : i32
    %c64_i32 = arith.constant 64 : i32
    %0 = arith.addi %c0_i32, %c64_i32 : i32
    %c1_i32 = arith.constant 1 : i32
    scf.for %arg12 = %c0_i32 to %0 step %c1_i32  : i32 {
      %c1_i32_95 = arith.constant 1 : i32
      %255 = arith.muli %arg12, %c1_i32_95 : i32
      %c0_i32_96 = arith.constant 0 : i32
      %256 = arith.addi %c0_i32_96, %255 : i32
      %257 = arith.index_cast %256 : i32 to index
      %258 = memref.load %arg0[%257] : memref<64xi32, #tpu.memory_space<smem>>
      %259 = arith.index_cast %258 : i32 to index
      %c0_97 = arith.constant 0 : index
      %260 = vector.load %arg1[%259, %c0_97] : memref<1000x128xf32, #tpu.memory_space<vmem>>, vector<1x128xf32>
      %261 = arith.index_cast %256 : i32 to index
      %c0_98 = arith.constant 0 : index
      %262 = vector.load %arg10[%261, %c0_98] : memref<64x128xf32, #tpu.memory_space<vmem>>, vector<1x128xf32>
      tpu.vector_store %arg10[%261, %c0_98], %260 {strides = array<i32>} : memref<64x128xf32, #tpu.memory_space<vmem>>, vector<1x128xf32>,
    }
    %c64_i32_0 = arith.constant 64 : i32
    %c0 = arith.constant 0 : index
    %c0_1 = arith.constant 0 : index
    %1 = vector.load %arg10[%c0, %c0_1] : memref<64x128xf32, #tpu.memory_space<vmem>>, vector<64x128xf32>
    %2 = arith.truncf %1 : vector<64x128xf32> to vector<64x128xbf16>
    %c0_2 = arith.constant 0 : index
    %c0_3 = arith.constant 0 : index
    %3 = vector.load %arg2[%c0_2, %c0_3] : memref<128x512xbf16, #tpu.memory_space<vmem>>, vector<128x512xbf16>
    %cst = arith.constant dense<0.000000e+00> : vector<64x512xf32>
    %4 = tpu.matmul %2, %3, %cst {dimension_numbers = #tpu.dot_dimension_numbers<[1], [0], [0], [1], [0, 0, 1, 1], [], []>} : vector<64x128xbf16>, vector<128x512xbf16>, vector<64x512xf32> -> vector<64x512xf32>
    %c0_4 = arith.constant 0 : index
    %c0_5 = arith.constant 0 : index
    %5 = vector.load %arg4[%c0_4, %c0_5] : memref<1x512xf32, #tpu.memory_space<vmem>>, vector<1x512xf32>
    %6 = vector.broadcast %5 : vector<1x512xf32> to vector<64x512xf32>
    %7 = arith.addf %4, %6 : vector<64x512xf32>
    %c0_6 = arith.constant 0 : index
    %c0_7 = arith.constant 0 : index
    %8 = vector.load %arg11[%c0_6, %c0_7] : memref<64x512xf32, #tpu.memory_space<vmem>>, vector<64x512xf32>
    tpu.vector_store %arg11[%c0_6, %c0_7], %7 {strides = array<i32>} : memref<64x512xf32, #tpu.memory_space<vmem>>, vector<64x512xf32>,
    %cst_8 = arith.constant 0.000000e+00 : f32
    %9 = vector.broadcast %cst_8 : f32 to vector<8x128xf32>
    %cst_9 = arith.constant 0.000000e+00 : f32
    %10 = vector.broadcast %cst_9 : f32 to vector<8x128xf32>
    %c0_i32_10 = arith.constant 0 : i32
    %c8_i32 = arith.constant 8 : i32
    %11 = arith.muli %c0_i32_10, %c8_i32 : i32
    %12 = tpu.assume_multiple %11, 8 : i32
    %13 = arith.index_cast %12 : i32 to index
    %c0_11 = arith.constant 0 : index
    %14 = vector.load %arg11[%13, %c0_11] : memref<64x512xf32, #tpu.memory_space<vmem>>, vector<8x512xf32>
    %15 = arith.truncf %9 : vector<8x128xf32> to vector<8x128xbf16>
    %c0_12 = arith.constant 0 : index
    %c0_13 = arith.constant 0 : index
    %16 = vector.load %arg3[%c0_12, %c0_13] : memref<128x512xbf16, #tpu.memory_space<vmem>>, vector<128x512xbf16>
    %cst_14 = arith.constant dense<0.000000e+00> : vector<8x512xf32>
    %17 = tpu.matmul %15, %16, %cst_14 {dimension_numbers = #tpu.dot_dimension_numbers<[1], [0], [0], [1], [0, 0, 1, 1], [], []>} : vector<8x128xbf16>, vector<128x512xbf16>, vector<8x512xf32> -> vector<8x512xf32>
    %18 = arith.addf %14, %17 : vector<8x512xf32>
    %19 = vector.extract_strided_slice %18 {offsets = [0, 0], sizes = [8, 384], strides = [1, 1]} : vector<8x512xf32> to vector<8x384xf32>
    %cst_15 = arith.constant 5.000000e-01 : f32
    %20 = vector.broadcast %cst_15 : f32 to vector<8x384xf32>
    %21 = arith.mulf %20, %19 : vector<8x384xf32>
    %22 = math.tanh %21 : vector<8x384xf32>
    %cst_16 = arith.constant 5.000000e-01 : f32
    %23 = vector.broadcast %cst_16 : f32 to vector<8x384xf32>
    %24 = arith.mulf %23, %22 : vector<8x384xf32>
    %cst_17 = arith.constant 5.000000e-01 : f32
    %25 = vector.broadcast %cst_17 : f32 to vector<8x384xf32>
    %26 = arith.addf %24, %25 : vector<8x384xf32>
    %27 = vector.extract_strided_slice %18 {offsets = [0, 384], sizes = [8, 128], strides = [1, 1]} : vector<8x512xf32> to vector<8x128xf32>
    %28 = math.tanh %27 : vector<8x128xf32>
    %29 = vector.extract_strided_slice %26 {offsets = [0, 128], sizes = [8, 128], strides = [1, 1]} : vector<8x384xf32> to vector<8x128xf32>
    %30 = arith.mulf %29, %10 : vector<8x128xf32>
    %31 = vector.extract_strided_slice %26 {offsets = [0, 0], sizes = [8, 128], strides = [1, 1]} : vector<8x384xf32> to vector<8x128xf32>
    %32 = arith.mulf %31, %28 : vector<8x128xf32>
    %33 = arith.addf %30, %32 : vector<8x128xf32>
    %34 = vector.extract_strided_slice %26 {offsets = [0, 256], sizes = [8, 128], strides = [1, 1]} : vector<8x384xf32> to vector<8x128xf32>
    %35 = math.tanh %33 : vector<8x128xf32>
    %36 = arith.mulf %34, %35 : vector<8x128xf32>
    %c1_i32_18 = arith.constant 1 : i32
    %c8_i32_19 = arith.constant 8 : i32
    %37 = arith.muli %c1_i32_18, %c8_i32_19 : i32
    %38 = tpu.assume_multiple %37, 8 : i32
    %39 = arith.index_cast %38 : i32 to index
    %c0_20 = arith.constant 0 : index
    %40 = vector.load %arg11[%39, %c0_20] : memref<64x512xf32, #tpu.memory_space<vmem>>, vector<8x512xf32>
    %41 = arith.truncf %36 : vector<8x128xf32> to vector<8x128xbf16>
    %c0_21 = arith.constant 0 : index
    %c0_22 = arith.constant 0 : index
    %42 = vector.load %arg3[%c0_21, %c0_22] : memref<128x512xbf16, #tpu.memory_space<vmem>>, vector<128x512xbf16>
    %cst_23 = arith.constant dense<0.000000e+00> : vector<8x512xf32>
    %43 = tpu.matmul %41, %42, %cst_23 {dimension_numbers = #tpu.dot_dimension_numbers<[1], [0], [0], [1], [0, 0, 1, 1], [], []>} : vector<8x128xbf16>, vector<128x512xbf16>, vector<8x512xf32> -> vector<8x512xf32>
    %44 = arith.addf %40, %43 : vector<8x512xf32>
    %45 = vector.extract_strided_slice %44 {offsets = [0, 0], sizes = [8, 384], strides = [1, 1]} : vector<8x512xf32> to vector<8x384xf32>
    %cst_24 = arith.constant 5.000000e-01 : f32
    %46 = vector.broadcast %cst_24 : f32 to vector<8x384xf32>
    %47 = arith.mulf %46, %45 : vector<8x384xf32>
    %48 = math.tanh %47 : vector<8x384xf32>
    %cst_25 = arith.constant 5.000000e-01 : f32
    %49 = vector.broadcast %cst_25 : f32 to vector<8x384xf32>
    %50 = arith.mulf %49, %48 : vector<8x384xf32>
    %cst_26 = arith.constant 5.000000e-01 : f32
    %51 = vector.broadcast %cst_26 : f32 to vector<8x384xf32>
    %52 = arith.addf %50, %51 : vector<8x384xf32>
    %53 = vector.extract_strided_slice %44 {offsets = [0, 384], sizes = [8, 128], strides = [1, 1]} : vector<8x512xf32> to vector<8x128xf32>
    %54 = math.tanh %53 : vector<8x128xf32>
    %55 = vector.extract_strided_slice %52 {offsets = [0, 128], sizes = [8, 128], strides = [1, 1]} : vector<8x384xf32> to vector<8x128xf32>
    %56 = arith.mulf %55, %33 : vector<8x128xf32>
    %57 = vector.extract_strided_slice %52 {offsets = [0, 0], sizes = [8, 128], strides = [1, 1]} : vector<8x384xf32> to vector<8x128xf32>
    %58 = arith.mulf %57, %54 : vector<8x128xf32>
    %59 = arith.addf %56, %58 : vector<8x128xf32>
    %60 = vector.extract_strided_slice %52 {offsets = [0, 256], sizes = [8, 128], strides = [1, 1]} : vector<8x384xf32> to vector<8x128xf32>
    %61 = math.tanh %59 : vector<8x128xf32>
    %62 = arith.mulf %60, %61 : vector<8x128xf32>
    %c2_i32 = arith.constant 2 : i32
    %c8_i32_27 = arith.constant 8 : i32
    %63 = arith.muli %c2_i32, %c8_i32_27 : i32
    %64 = tpu.assume_multiple %63, 8 : i32
    %65 = arith.index_cast %64 : i32 to index
    %c0_28 = arith.constant 0 : index
    %66 = vector.load %arg11[%65, %c0_28] : memref<64x512xf32, #tpu.memory_space<vmem>>, vector<8x512xf32>
    %67 = arith.truncf %62 : vector<8x128xf32> to vector<8x128xbf16>
    %c0_29 = arith.constant 0 : index
    %c0_30 = arith.constant 0 : index
    %68 = vector.load %arg3[%c0_29, %c0_30] : memref<128x512xbf16, #tpu.memory_space<vmem>>, vector<128x512xbf16>
    %cst_31 = arith.constant dense<0.000000e+00> : vector<8x512xf32>
    %69 = tpu.matmul %67, %68, %cst_31 {dimension_numbers = #tpu.dot_dimension_numbers<[1], [0], [0], [1], [0, 0, 1, 1], [], []>} : vector<8x128xbf16>, vector<128x512xbf16>, vector<8x512xf32> -> vector<8x512xf32>
    %70 = arith.addf %66, %69 : vector<8x512xf32>
    %71 = vector.extract_strided_slice %70 {offsets = [0, 0], sizes = [8, 384], strides = [1, 1]} : vector<8x512xf32> to vector<8x384xf32>
    %cst_32 = arith.constant 5.000000e-01 : f32
    %72 = vector.broadcast %cst_32 : f32 to vector<8x384xf32>
    %73 = arith.mulf %72, %71 : vector<8x384xf32>
    %74 = math.tanh %73 : vector<8x384xf32>
    %cst_33 = arith.constant 5.000000e-01 : f32
    %75 = vector.broadcast %cst_33 : f32 to vector<8x384xf32>
    %76 = arith.mulf %75, %74 : vector<8x384xf32>
    %cst_34 = arith.constant 5.000000e-01 : f32
    %77 = vector.broadcast %cst_34 : f32 to vector<8x384xf32>
    %78 = arith.addf %76, %77 : vector<8x384xf32>
    %79 = vector.extract_strided_slice %70 {offsets = [0, 384], sizes = [8, 128], strides = [1, 1]} : vector<8x512xf32> to vector<8x128xf32>
    %80 = math.tanh %79 : vector<8x128xf32>
    %81 = vector.extract_strided_slice %78 {offsets = [0, 128], sizes = [8, 128], strides = [1, 1]} : vector<8x384xf32> to vector<8x128xf32>
    %82 = arith.mulf %81, %59 : vector<8x128xf32>
    %83 = vector.extract_strided_slice %78 {offsets = [0, 0], sizes = [8, 128], strides = [1, 1]} : vector<8x384xf32> to vector<8x128xf32>
    %84 = arith.mulf %83, %80 : vector<8x128xf32>
    %85 = arith.addf %82, %84 : vector<8x128xf32>
    %86 = vector.extract_strided_slice %78 {offsets = [0, 256], sizes = [8, 128], strides = [1, 1]} : vector<8x384xf32> to vector<8x128xf32>
    %87 = math.tanh %85 : vector<8x128xf32>
    %88 = arith.mulf %86, %87 : vector<8x128xf32>
    %c3_i32 = arith.constant 3 : i32
    %c8_i32_35 = arith.constant 8 : i32
    %89 = arith.muli %c3_i32, %c8_i32_35 : i32
    %90 = tpu.assume_multiple %89, 8 : i32
    %91 = arith.index_cast %90 : i32 to index
    %c0_36 = arith.constant 0 : index
    %92 = vector.load %arg11[%91, %c0_36] : memref<64x512xf32, #tpu.memory_space<vmem>>, vector<8x512xf32>
    %93 = arith.truncf %88 : vector<8x128xf32> to vector<8x128xbf16>
    %c0_37 = arith.constant 0 : index
    %c0_38 = arith.constant 0 : index
    %94 = vector.load %arg3[%c0_37, %c0_38] : memref<128x512xbf16, #tpu.memory_space<vmem>>, vector<128x512xbf16>
    %cst_39 = arith.constant dense<0.000000e+00> : vector<8x512xf32>
    %95 = tpu.matmul %93, %94, %cst_39 {dimension_numbers = #tpu.dot_dimension_numbers<[1], [0], [0], [1], [0, 0, 1, 1], [], []>} : vector<8x128xbf16>, vector<128x512xbf16>, vector<8x512xf32> -> vector<8x512xf32>
    %96 = arith.addf %92, %95 : vector<8x512xf32>
    %97 = vector.extract_strided_slice %96 {offsets = [0, 0], sizes = [8, 384], strides = [1, 1]} : vector<8x512xf32> to vector<8x384xf32>
    %cst_40 = arith.constant 5.000000e-01 : f32
    %98 = vector.broadcast %cst_40 : f32 to vector<8x384xf32>
    %99 = arith.mulf %98, %97 : vector<8x384xf32>
    %100 = math.tanh %99 : vector<8x384xf32>
    %cst_41 = arith.constant 5.000000e-01 : f32
    %101 = vector.broadcast %cst_41 : f32 to vector<8x384xf32>
    %102 = arith.mulf %101, %100 : vector<8x384xf32>
    %cst_42 = arith.constant 5.000000e-01 : f32
    %103 = vector.broadcast %cst_42 : f32 to vector<8x384xf32>
    %104 = arith.addf %102, %103 : vector<8x384xf32>
    %105 = vector.extract_strided_slice %96 {offsets = [0, 384], sizes = [8, 128], strides = [1, 1]} : vector<8x512xf32> to vector<8x128xf32>
    %106 = math.tanh %105 : vector<8x128xf32>
    %107 = vector.extract_strided_slice %104 {offsets = [0, 128], sizes = [8, 128], strides = [1, 1]} : vector<8x384xf32> to vector<8x128xf32>
    %108 = arith.mulf %107, %85 : vector<8x128xf32>
    %109 = vector.extract_strided_slice %104 {offsets = [0, 0], sizes = [8, 128], strides = [1, 1]} : vector<8x384xf32> to vector<8x128xf32>
    %110 = arith.mulf %109, %106 : vector<8x128xf32>
    %111 = arith.addf %108, %110 : vector<8x128xf32>
    %112 = vector.extract_strided_slice %104 {offsets = [0, 256], sizes = [8, 128], strides = [1, 1]} : vector<8x384xf32> to vector<8x128xf32>
    %113 = math.tanh %111 : vector<8x128xf32>
    %114 = arith.mulf %112, %113 : vector<8x128xf32>
    %c4_i32 = arith.constant 4 : i32
    %c8_i32_43 = arith.constant 8 : i32
    %115 = arith.muli %c4_i32, %c8_i32_43 : i32
    %116 = tpu.assume_multiple %115, 8 : i32
    %117 = arith.index_cast %116 : i32 to index
    %c0_44 = arith.constant 0 : index
    %118 = vector.load %arg11[%117, %c0_44] : memref<64x512xf32, #tpu.memory_space<vmem>>, vector<8x512xf32>
    %119 = arith.truncf %114 : vector<8x128xf32> to vector<8x128xbf16>
    %c0_45 = arith.constant 0 : index
    %c0_46 = arith.constant 0 : index
    %120 = vector.load %arg3[%c0_45, %c0_46] : memref<128x512xbf16, #tpu.memory_space<vmem>>, vector<128x512xbf16>
    %cst_47 = arith.constant dense<0.000000e+00> : vector<8x512xf32>
    %121 = tpu.matmul %119, %120, %cst_47 {dimension_numbers = #tpu.dot_dimension_numbers<[1], [0], [0], [1], [0, 0, 1, 1], [], []>} : vector<8x128xbf16>, vector<128x512xbf16>, vector<8x512xf32> -> vector<8x512xf32>
    %122 = arith.addf %118, %121 : vector<8x512xf32>
    %123 = vector.extract_strided_slice %122 {offsets = [0, 0], sizes = [8, 384], strides = [1, 1]} : vector<8x512xf32> to vector<8x384xf32>
    %cst_48 = arith.constant 5.000000e-01 : f32
    %124 = vector.broadcast %cst_48 : f32 to vector<8x384xf32>
    %125 = arith.mulf %124, %123 : vector<8x384xf32>
    %126 = math.tanh %125 : vector<8x384xf32>
    %cst_49 = arith.constant 5.000000e-01 : f32
    %127 = vector.broadcast %cst_49 : f32 to vector<8x384xf32>
    %128 = arith.mulf %127, %126 : vector<8x384xf32>
    %cst_50 = arith.constant 5.000000e-01 : f32
    %129 = vector.broadcast %cst_50 : f32 to vector<8x384xf32>
    %130 = arith.addf %128, %129 : vector<8x384xf32>
    %131 = vector.extract_strided_slice %122 {offsets = [0, 384], sizes = [8, 128], strides = [1, 1]} : vector<8x512xf32> to vector<8x128xf32>
    %132 = math.tanh %131 : vector<8x128xf32>
    %133 = vector.extract_strided_slice %130 {offsets = [0, 128], sizes = [8, 128], strides = [1, 1]} : vector<8x384xf32> to vector<8x128xf32>
    %134 = arith.mulf %133, %111 : vector<8x128xf32>
    %135 = vector.extract_strided_slice %130 {offsets = [0, 0], sizes = [8, 128], strides = [1, 1]} : vector<8x384xf32> to vector<8x128xf32>
    %136 = arith.mulf %135, %132 : vector<8x128xf32>
    %137 = arith.addf %134, %136 : vector<8x128xf32>
    %138 = vector.extract_strided_slice %130 {offsets = [0, 256], sizes = [8, 128], strides = [1, 1]} : vector<8x384xf32> to vector<8x128xf32>
    %139 = math.tanh %137 : vector<8x128xf32>
    %140 = arith.mulf %138, %139 : vector<8x128xf32>
    %c5_i32 = arith.constant 5 : i32
    %c8_i32_51 = arith.constant 8 : i32
    %141 = arith.muli %c5_i32, %c8_i32_51 : i32
    %142 = tpu.assume_multiple %141, 8 : i32
    %143 = arith.index_cast %142 : i32 to index
    %c0_52 = arith.constant 0 : index
    %144 = vector.load %arg11[%143, %c0_52] : memref<64x512xf32, #tpu.memory_space<vmem>>, vector<8x512xf32>
    %145 = arith.truncf %140 : vector<8x128xf32> to vector<8x128xbf16>
    %c0_53 = arith.constant 0 : index
    %c0_54 = arith.constant 0 : index
    %146 = vector.load %arg3[%c0_53, %c0_54] : memref<128x512xbf16, #tpu.memory_space<vmem>>, vector<128x512xbf16>
    %cst_55 = arith.constant dense<0.000000e+00> : vector<8x512xf32>
    %147 = tpu.matmul %145, %146, %cst_55 {dimension_numbers = #tpu.dot_dimension_numbers<[1], [0], [0], [1], [0, 0, 1, 1], [], []>} : vector<8x128xbf16>, vector<128x512xbf16>, vector<8x512xf32> -> vector<8x512xf32>
    %148 = arith.addf %144, %147 : vector<8x512xf32>
    %149 = vector.extract_strided_slice %148 {offsets = [0, 0], sizes = [8, 384], strides = [1, 1]} : vector<8x512xf32> to vector<8x384xf32>
    %cst_56 = arith.constant 5.000000e-01 : f32
    %150 = vector.broadcast %cst_56 : f32 to vector<8x384xf32>
    %151 = arith.mulf %150, %149 : vector<8x384xf32>
    %152 = math.tanh %151 : vector<8x384xf32>
    %cst_57 = arith.constant 5.000000e-01 : f32
    %153 = vector.broadcast %cst_57 : f32 to vector<8x384xf32>
    %154 = arith.mulf %153, %152 : vector<8x384xf32>
    %cst_58 = arith.constant 5.000000e-01 : f32
    %155 = vector.broadcast %cst_58 : f32 to vector<8x384xf32>
    %156 = arith.addf %154, %155 : vector<8x384xf32>
    %157 = vector.extract_strided_slice %148 {offsets = [0, 384], sizes = [8, 128], strides = [1, 1]} : vector<8x512xf32> to vector<8x128xf32>
    %158 = math.tanh %157 : vector<8x128xf32>
    %159 = vector.extract_strided_slice %156 {offsets = [0, 128], sizes = [8, 128], strides = [1, 1]} : vector<8x384xf32> to vector<8x128xf32>
    %160 = arith.mulf %159, %137 : vector<8x128xf32>
    %161 = vector.extract_strided_slice %156 {offsets = [0, 0], sizes = [8, 128], strides = [1, 1]} : vector<8x384xf32> to vector<8x128xf32>
    %162 = arith.mulf %161, %158 : vector<8x128xf32>
    %163 = arith.addf %160, %162 : vector<8x128xf32>
    %164 = vector.extract_strided_slice %156 {offsets = [0, 256], sizes = [8, 128], strides = [1, 1]} : vector<8x384xf32> to vector<8x128xf32>
    %165 = math.tanh %163 : vector<8x128xf32>
    %166 = arith.mulf %164, %165 : vector<8x128xf32>
    %c6_i32 = arith.constant 6 : i32
    %c8_i32_59 = arith.constant 8 : i32
    %167 = arith.muli %c6_i32, %c8_i32_59 : i32
    %168 = tpu.assume_multiple %167, 8 : i32
    %169 = arith.index_cast %168 : i32 to index
    %c0_60 = arith.constant 0 : index
    %170 = vector.load %arg11[%169, %c0_60] : memref<64x512xf32, #tpu.memory_space<vmem>>, vector<8x512xf32>
    %171 = arith.truncf %166 : vector<8x128xf32> to vector<8x128xbf16>
    %c0_61 = arith.constant 0 : index
    %c0_62 = arith.constant 0 : index
    %172 = vector.load %arg3[%c0_61, %c0_62] : memref<128x512xbf16, #tpu.memory_space<vmem>>, vector<128x512xbf16>
    %cst_63 = arith.constant dense<0.000000e+00> : vector<8x512xf32>
    %173 = tpu.matmul %171, %172, %cst_63 {dimension_numbers = #tpu.dot_dimension_numbers<[1], [0], [0], [1], [0, 0, 1, 1], [], []>} : vector<8x128xbf16>, vector<128x512xbf16>, vector<8x512xf32> -> vector<8x512xf32>
    %174 = arith.addf %170, %173 : vector<8x512xf32>
    %175 = vector.extract_strided_slice %174 {offsets = [0, 0], sizes = [8, 384], strides = [1, 1]} : vector<8x512xf32> to vector<8x384xf32>
    %cst_64 = arith.constant 5.000000e-01 : f32
    %176 = vector.broadcast %cst_64 : f32 to vector<8x384xf32>
    %177 = arith.mulf %176, %175 : vector<8x384xf32>
    %178 = math.tanh %177 : vector<8x384xf32>
    %cst_65 = arith.constant 5.000000e-01 : f32
    %179 = vector.broadcast %cst_65 : f32 to vector<8x384xf32>
    %180 = arith.mulf %179, %178 : vector<8x384xf32>
    %cst_66 = arith.constant 5.000000e-01 : f32
    %181 = vector.broadcast %cst_66 : f32 to vector<8x384xf32>
    %182 = arith.addf %180, %181 : vector<8x384xf32>
    %183 = vector.extract_strided_slice %174 {offsets = [0, 384], sizes = [8, 128], strides = [1, 1]} : vector<8x512xf32> to vector<8x128xf32>
    %184 = math.tanh %183 : vector<8x128xf32>
    %185 = vector.extract_strided_slice %182 {offsets = [0, 128], sizes = [8, 128], strides = [1, 1]} : vector<8x384xf32> to vector<8x128xf32>
    %186 = arith.mulf %185, %163 : vector<8x128xf32>
    %187 = vector.extract_strided_slice %182 {offsets = [0, 0], sizes = [8, 128], strides = [1, 1]} : vector<8x384xf32> to vector<8x128xf32>
    %188 = arith.mulf %187, %184 : vector<8x128xf32>
    %189 = arith.addf %186, %188 : vector<8x128xf32>
    %190 = vector.extract_strided_slice %182 {offsets = [0, 256], sizes = [8, 128], strides = [1, 1]} : vector<8x384xf32> to vector<8x128xf32>
    %191 = math.tanh %189 : vector<8x128xf32>
    %192 = arith.mulf %190, %191 : vector<8x128xf32>
    %c7_i32 = arith.constant 7 : i32
    %c8_i32_67 = arith.constant 8 : i32
    %193 = arith.muli %c7_i32, %c8_i32_67 : i32
    %194 = tpu.assume_multiple %193, 8 : i32
    %195 = arith.index_cast %194 : i32 to index
    %c0_68 = arith.constant 0 : index
    %196 = vector.load %arg11[%195, %c0_68] : memref<64x512xf32, #tpu.memory_space<vmem>>, vector<8x512xf32>
    %197 = arith.truncf %192 : vector<8x128xf32> to vector<8x128xbf16>
    %c0_69 = arith.constant 0 : index
    %c0_70 = arith.constant 0 : index
    %198 = vector.load %arg3[%c0_69, %c0_70] : memref<128x512xbf16, #tpu.memory_space<vmem>>, vector<128x512xbf16>
    %cst_71 = arith.constant dense<0.000000e+00> : vector<8x512xf32>
    %199 = tpu.matmul %197, %198, %cst_71 {dimension_numbers = #tpu.dot_dimension_numbers<[1], [0], [0], [1], [0, 0, 1, 1], [], []>} : vector<8x128xbf16>, vector<128x512xbf16>, vector<8x512xf32> -> vector<8x512xf32>
    %200 = arith.addf %196, %199 : vector<8x512xf32>
    %201 = vector.extract_strided_slice %200 {offsets = [0, 0], sizes = [8, 384], strides = [1, 1]} : vector<8x512xf32> to vector<8x384xf32>
    %cst_72 = arith.constant 5.000000e-01 : f32
    %202 = vector.broadcast %cst_72 : f32 to vector<8x384xf32>
    %203 = arith.mulf %202, %201 : vector<8x384xf32>
    %204 = math.tanh %203 : vector<8x384xf32>
    %cst_73 = arith.constant 5.000000e-01 : f32
    %205 = vector.broadcast %cst_73 : f32 to vector<8x384xf32>
    %206 = arith.mulf %205, %204 : vector<8x384xf32>
    %cst_74 = arith.constant 5.000000e-01 : f32
    %207 = vector.broadcast %cst_74 : f32 to vector<8x384xf32>
    %208 = arith.addf %206, %207 : vector<8x384xf32>
    %209 = vector.extract_strided_slice %200 {offsets = [0, 384], sizes = [8, 128], strides = [1, 1]} : vector<8x512xf32> to vector<8x128xf32>
    %210 = math.tanh %209 : vector<8x128xf32>
    %211 = vector.extract_strided_slice %208 {offsets = [0, 128], sizes = [8, 128], strides = [1, 1]} : vector<8x384xf32> to vector<8x128xf32>
    %212 = arith.mulf %211, %189 : vector<8x128xf32>
    %213 = vector.extract_strided_slice %208 {offsets = [0, 0], sizes = [8, 128], strides = [1, 1]} : vector<8x384xf32> to vector<8x128xf32>
    %214 = arith.mulf %213, %210 : vector<8x128xf32>
    %215 = arith.addf %212, %214 : vector<8x128xf32>
    %216 = vector.extract_strided_slice %208 {offsets = [0, 256], sizes = [8, 128], strides = [1, 1]} : vector<8x384xf32> to vector<8x128xf32>
    %217 = math.tanh %215 : vector<8x128xf32>
    %218 = arith.mulf %216, %217 : vector<8x128xf32>
    %c8_i32_75 = arith.constant 8 : i32
    %219 = arith.truncf %218 : vector<8x128xf32> to vector<8x128xbf16>
    %c0_76 = arith.constant 0 : index
    %c0_77 = arith.constant 0 : index
    %220 = vector.load %arg5[%c0_76, %c0_77] : memref<128x128xbf16, #tpu.memory_space<vmem>>, vector<128x128xbf16>
    %cst_78 = arith.constant dense<0.000000e+00> : vector<8x128xf32>
    %221 = tpu.matmul %219, %220, %cst_78 {dimension_numbers = #tpu.dot_dimension_numbers<[1], [0], [0], [1], [0, 0, 1, 1], [], []>} : vector<8x128xbf16>, vector<128x128xbf16>, vector<8x128xf32> -> vector<8x128xf32>
    %c0_79 = arith.constant 0 : index
    %c0_80 = arith.constant 0 : index
    %222 = vector.load %arg6[%c0_79, %c0_80] : memref<1x128xf32, #tpu.memory_space<vmem>>, vector<1x128xf32>
    %223 = vector.broadcast %222 : vector<1x128xf32> to vector<8x128xf32>
    %224 = arith.addf %221, %223 : vector<8x128xf32>
    %c0_81 = arith.constant 0 : index
    %c0_82 = arith.constant 0 : index
    %225 = vector.load %arg8[%c0_81, %c0_82] : memref<8x128xf32, #tpu.memory_space<vmem>>, vector<8x128xf32>
    tpu.vector_store %arg8[%c0_81, %c0_82], %224 {strides = array<i32>} : memref<8x128xf32, #tpu.memory_space<vmem>>, vector<8x128xf32>,
    %c0_83 = arith.constant 0 : index
    %c0_84 = arith.constant 0 : index
    %226 = vector.load %arg7[%c0_83, %c0_84] : memref<8x128xf32, #tpu.memory_space<vmem>>, vector<8x128xf32>
    %cst_85 = arith.constant 0.000000e+00 : f32
    %227 = vector.broadcast %cst_85 : f32 to vector<8x128xf32>
    %228 = arith.maximumf %224, %227 : vector<8x128xf32>
    %229 = arith.mulf %224, %226 : vector<8x128xf32>
    %230 = arith.subf %228, %229 : vector<8x128xf32>
    %231 = math.absf %224 : vector<8x128xf32>
    %cst_86 = arith.constant 0.000000e+00 : f32
    %232 = vector.broadcast %cst_86 : f32 to vector<8x128xf32>
    %233 = arith.subf %232, %231 : vector<8x128xf32>
    %234 = math.exp %233 : vector<8x128xf32>
    %cst_87 = arith.constant 1.000000e+00 : f32
    %235 = vector.broadcast %cst_87 : f32 to vector<8x128xf32>
    %236 = arith.addf %235, %234 : vector<8x128xf32>
    %237 = math.log %236 : vector<8x128xf32>
    %238 = arith.addf %230, %237 : vector<8x128xf32>
    %239 = tpu.iota {dimensions = array<i32: 0>} : vector<8x128xi32>
    %c8_i32_88 = arith.constant 8 : i32
    %240 = vector.broadcast %c8_i32_88 : i32 to vector<8x128xi32>
    %241 = arith.cmpi slt, %239, %240 : vector<8x128xi32>
    %242 = tpu.iota {dimensions = array<i32: 1>} : vector<8x128xi32>
    %c24_i32 = arith.constant 24 : i32
    %243 = vector.broadcast %c24_i32 : i32 to vector<8x128xi32>
    %244 = arith.cmpi slt, %242, %243 : vector<8x128xi32>
    %245 = arith.andi %241, %244 : vector<8x128xi1>
    %cst_89 = arith.constant 0.000000e+00 : f32
    %246 = vector.broadcast %cst_89 : f32 to vector<8x128xf32>
    %247 = arith.select %245, %238, %246 : vector<8x128xi1>, vector<8x128xf32>
    %cst_90 = arith.constant dense<0.000000e+00> : vector<8xf32>
    %248 = vector.multi_reduction <add>, %247, %cst_90 [1] : vector<8x128xf32> to vector<8xf32>
    %249 = vector.shape_cast %248 : vector<8xf32> to vector<8x1xf32>
    %cst_91 = arith.constant dense<0.000000e+00> : vector<1xf32>
    %250 = vector.multi_reduction <add>, %249, %cst_91 [0] : vector<8x1xf32> to vector<1xf32>
    %251 = vector.shape_cast %250 : vector<1xf32> to vector<1x1xf32>
    %cst_92 = arith.constant 0.00520833349 : f32
    %252 = vector.broadcast %cst_92 : f32 to vector<1x1xf32>
    %253 = arith.mulf %251, %252 : vector<1x1xf32>
    %c0_93 = arith.constant 0 : index
    %c0_94 = arith.constant 0 : index
    %254 = vector.load %arg9[%c0_93, %c0_94] : memref<1x1xf32, #tpu.memory_space<vmem>>, vector<1x1xf32>
    tpu.vector_store %arg9[%c0_93, %c0_94], %253 {strides = array<i32>} : memref<1x1xf32, #tpu.memory_space<vmem>>, vector<1x1xf32>,
    return
  }
}

</mosaic_0001>

<bundles_post_ra>
// kernel: lstm_classifier_forward.1
= control target key start
LH: loop header
LB: loop body
LE: loop exit
PB: predicated region body
PF: predicated region fallthrough
CT: control target
= control target key end

     0   :  { %15 = vsyncpa [#allocation6], 0  ;;  %s3069_s0 = inlined_call_operand.vmem [shape: s32[64], index: 0, kind: input, shape index: {}]   ;;  %s3070_s1 = inlined_call_operand.vmem [shape: f32[1000,128], index: 1, kind: input, shape index: {}]   ;;  %s3071_s2 = inlined_call_operand.vmem [shape: bf16[128,512], index: 2, kind: input, shape index: {}]   ;;  %s3072_s3 = inlined_call_operand.vmem [shape: bf16[128,512], index: 3, kind: input, shape index: {}]   ;;  %s3073_s4 = inlined_call_operand.vmem [shape: f32[1,512], index: 4, kind: input, shape index: {}]   ;;  %s3074_s5 = inlined_call_operand.vmem [shape: bf16[128,128], index: 5, kind: input, shape index: {}]   ;;  %s3075_s6 = inlined_call_operand.vmem [shape: f32[1,128], index: 6, kind: input, shape index: {}]   ;;  %s3076_s7 = inlined_call_operand.vmem [shape: f32[8,128], index: 7, kind: input, shape index: {}]   ;;  %s3077_s8 = inlined_call_operand.hbm [shape: f32[8,128], index: 8, kind: output, shape index: {0}]   ;;  %s3078_s9 = inlined_call_operand.hbm [shape: f32[1,1], index: 9, kind: output, shape index: {1}]  }
   0x1   :  { %16 = vsyncpa [#allocation5], 0 }
   0x2   :  { %17 = vsyncpa [#allocation9], 0  ;;  %s24_s11 = sshll.u32 %s3069_s0, 4  ;;  %s25_s11 = int_to_ptr.vmem [resolvable:$true] %s24_s11 }
   0x3   :  { %s2072_s12 = scalar_lea.vmem %s25_s11, 16  ;;  %p2077_p1 = scmp.lt.s32.totalorder %s25_s11, %s25_s11 }
   0x4   :  { %p2073_p0 = scmp.ne.s32.totalorder %s25_s11, %s2072_s12  ;;  %p2078_p2 = scmp.lt.s32.totalorder %s2072_s12, %s2072_s12 }
   0x6   :  { %p2079_p3 = por %p2078_p2, %p2077_p1 }
   0x8   :  { %p2080_p4 = pnand %p2079_p3, %p2073_p0 }
   0xa   :  { %2083 = shalt.err (!%p2080_p4)
}
   0xb   :  { %s2142_s13 = smov [#allocation4]  }
   0xc   :  { %27 = dma.vmem_to_smem %s25_s11, 16, %s2142_s13, [#allocation6]  }
   0xd   :  { %2132 = dma.done.wait [#allocation6], 16  }
   0xe   :  { %2133 = vsyncadd [#allocation6], 4294967280 }
   0xf   :  { %45 = sfence }
  0x10   :  { %s2138_s14 = smov 0  }
  0x11 LB: > { %s53_s15 = sld [smem:[#allocation4 + %s2140_s14]]  ;;  %s56_s18 = scalar_lea.vmem [#allocation2], %s2140_s14  ;;  %s2140_s14 = sphi %s2138_s14, %s52_s14  }
  0x12   : > { %s52_s14 = sadd.s32 1, %s2140_s14  }
  0x13   : > { %p49_p5 = scmp.ge.s32.totalorder %s52_s14, 64  }
  0x14   :  { %v1852_v1 = vld [vmem:[%s3071_s2 + $0x4] ss:$16 sps:$4 sm:$0xff] (%p49_p5)   ;;  %v1854_v2 = vld [vmem:[%s3071_s2 + $0xc] ss:$16 sps:$4 sm:$0xff] (%p49_p5)   ;;  %v3080_v3 = vmov (%p49_p5), 0   ;;  %vm2145_vm0 = vmmov (%p49_p5), 0  }
  0x15   :  { %51 = sbr.rel (!%p49_p5) target bundleno = 17 (0x11), region = 81  ;;  %316 = vmatprep.mubr.bf16.mxu0 (%p49_p5), %v3080_v3  ;;  %389 = vmatprep.mubr.bf16.mxu1 (%p49_p5), %v3080_v3  ;;  %v1856_v4 = vld [vmem:[%s3071_s2] ss:$16 sps:$4 sm:$0xff] (%p49_p5)   ;;  %v1857_v5 = vld [vmem:[%s3071_s2 + $0x8] ss:$16 sps:$4 sm:$0xff] (%p49_p5)  }
  0x16   :  { %284 = vmatprep.subr.bf16.mxu0 (%p49_p5), %v1852_v1  ;;  %357 = vmatprep.subr.bf16.mxu1 (%p49_p5), %v1854_v2  ;;  %v1858_v6 = vld [vmem:[%s3071_s2 + $0x24] ss:$16 sps:$4 sm:$0xff] (%p49_p5)   ;;  %v1860_v7 = vld [vmem:[%s3071_s2 + $0x2c] ss:$16 sps:$4 sm:$0xff] (%p49_p5)   ;;  %v1862_v8 = vld [vmem:[%s3071_s2 + $0x20] ss:$16 sps:$4 sm:$0xff] (%p49_p5)  }
  0x17   : > { %s54_s17 = scalar_lea.vmem %s3070_s1, %s53_s15  ;;  %285 = vmatpush1.bf16.msra.mxu0 (%p49_p5), %v1856_v4  ;;  %358 = vmatpush1.bf16.msra.mxu1 (%p49_p5), %v1857_v5  ;;  %v1863_v9 = vld [vmem:[%s3071_s2 + $0x28] ss:$16 sps:$4 sm:$0xff] (%p49_p5)   ;;  %v1864_v10 = vld [vmem:[%s3071_s2 + $0x44] ss:$16 sps:$4 sm:$0xff] (%p49_p5)   ;;  %v1866_v11 = vld [vmem:[%s3071_s2 + $0x4c] ss:$16 sps:$4 sm:$0xff] (%p49_p5)  }
  0x18   : > { %v55_v0 = vld [vmem:[%s54_s17] sm:$0x1]  ;;  %286 = vmatprep.subr.bf16.mxu0 (%p49_p5), %v1858_v6  ;;  %359 = vmatprep.subr.bf16.mxu1 (%p49_p5), %v1860_v7  ;;  %v1869_v13 = vld [vmem:[%s3071_s2 + $0x48] ss:$16 sps:$4 sm:$0xff] (%p49_p5)   ;;  %v1870_v14 = vld [vmem:[%s3071_s2 + $0x64] ss:$16 sps:$4 sm:$0xff] (%p49_p5)  }
  0x19   : > { %57 = vst [vmem:[%s56_s18] sm:$0x1] %v55_v0  ;;  %v1868_v12 = vld [vmem:[%s3071_s2 + $0x40] ss:$16 sps:$4 sm:$0xff] (%p49_p5)   ;;  %v1872_v15 = vld [vmem:[%s3071_s2 + $0x6c] ss:$16 sps:$4 sm:$0xff] (%p49_p5)  }
  0x1a   :  { %v1874_v16 = vld [vmem:[%s3071_s2 + $0x60] ss:$16 sps:$4 sm:$0xff] (%p49_p5)   ;;  %v1875_v17 = vld [vmem:[%s3071_s2 + $0x68] ss:$16 sps:$4 sm:$0xff] (%p49_p5)   ;;  %v1876_v18 = vld [vmem:[%s3071_s2 + $0x84] ss:$16 sps:$4 sm:$0xff] (%p49_p5)  }
  0x1b   :  { %287 = vmatpush1.bf16.msra.mxu0 (%p49_p5), %v1862_v8  ;;  %360 = vmatpush1.bf16.msra.mxu1 (%p49_p5), %v1863_v9  ;;  %v1878_v19 = vld [vmem:[%s3071_s2 + $0x8c] ss:$16 sps:$4 sm:$0xff] (%p49_p5)   ;;  %v1880_v20 = vld [vmem:[%s3071_s2 + $0x80] ss:$16 sps:$4 sm:$0xff] (%p49_p5)   ;;  %v1881_v21 = vld [vmem:[%s3071_s2 + $0x88] ss:$16 sps:$4 sm:$0xff] (%p49_p5)  }
  0x1c   :  { %288 = vmatprep.subr.bf16.mxu0 %v1864_v10  ;;  %361 = vmatprep.subr.bf16.mxu1 %v1866_v11  ;;  %v1882_v22 = vld [vmem:[%s3071_s2 + $0xa4] ss:$16 sps:$4 sm:$0xff]   ;;  %v1884_v23 = vld [vmem:[%s3071_s2 + $0xac] ss:$16 sps:$4 sm:$0xff]   ;;  %v1886_v24 = vld [vmem:[%s3071_s2 + $0xa0] ss:$16 sps:$4 sm:$0xff]  }
  0x1d   :  { %v1887_v25 = vld [vmem:[%s3071_s2 + $0xa8] ss:$16 sps:$4 sm:$0xff]   ;;  %v1888_v26 = vld [vmem:[%s3071_s2 + $0xc4] ss:$16 sps:$4 sm:$0xff]   ;;  %v1890_v27 = vld [vmem:[%s3071_s2 + $0xcc] ss:$16 sps:$4 sm:$0xff]  }
  0x1e   :  { %v1892_v28 = vld [vmem:[%s3071_s2 + $0xc0] ss:$16 sps:$4 sm:$0xff]   ;;  %v1893_v29 = vld [vmem:[%s3071_s2 + $0xc8] ss:$16 sps:$4 sm:$0xff]   ;;  %v1894_v30 = vld [vmem:[%s3071_s2 + $0xe4] ss:$16 sps:$4 sm:$0xff]  }
  0x1f   :  { %289 = vmatpush1.bf16.msra.mxu0 %v1868_v12  ;;  %362 = vmatpush1.bf16.msra.mxu1 %v1869_v13  ;;  %v1896_v31 = vld [vmem:[%s3071_s2 + $0xec] ss:$16 sps:$4 sm:$0xff]   ;;  %v1898_v32 = vld [vmem:[%s3071_s2 + $0xe0] ss:$16 sps:$4 sm:$0xff]   ;;  %v1899_v33 = vld [vmem:[%s3071_s2 + $0xe8] ss:$16 sps:$4 sm:$0xff]  }
  0x20   :  { %290 = vmatprep.subr.bf16.mxu0 %v1870_v14  ;;  %363 = vmatprep.subr.bf16.mxu1 %v1872_v15  ;;  %v58_v34 = vld [vmem:[#allocation2] sm:$0xff]  ;;  %v59_v35 = vld [vmem:[#allocation2 + $0x8] sm:$0xff]  ;;  %v60_v45 = vld [vmem:[#allocation2 + $0x10] sm:$0xff]  ;;  %v3079_v15 = vlaneseq }
  0x21   :  { %v2305_v36 = vld [vmem:[%s3072_s3 + $0x4] ss:$16 sps:$4 sm:$0xff]   ;;  %v2310_v37 = vld [vmem:[%s3072_s3 + $0xc] ss:$16 sps:$4 sm:$0xff]   ;;  %v66_v38 = vpack.c.bf16 %v59_v35, %v58_v34  ;;  %v2315_v39 = vld [vmem:[%s3072_s3] ss:$16 sps:$4 sm:$0xff]  }
  0x22   :  { %v2320_v40 = vld [vmem:[%s3072_s3 + $0x8] ss:$16 sps:$4 sm:$0xff]   ;;  %v2327_v41 = vld [vmem:[%s3072_s3 + $0x24] ss:$16 sps:$4 sm:$0xff]   ;;  %v2332_v42 = vld [vmem:[%s3072_s3 + $0x2c] ss:$16 sps:$4 sm:$0xff]  }
  0x23   :  { %291 = vmatpush1.bf16.msra.mxu0 %v1874_v16  ;;  %364 = vmatpush1.bf16.msra.mxu1 %v1875_v17  ;;  %v2337_v43 = vld [vmem:[%s3072_s3 + $0x20] ss:$16 sps:$4 sm:$0xff]   ;;  %v2342_v44 = vld [vmem:[%s3072_s3 + $0x28] ss:$16 sps:$4 sm:$0xff]   ;;  %v2349_v47 = vld [vmem:[%s3072_s3 + $0x44] ss:$16 sps:$4 sm:$0xff]  }
  0x24   :  { %292 = vmatprep.subr.bf16.mxu0 %v1876_v18  ;;  %365 = vmatprep.subr.bf16.mxu1 %v1878_v19  ;;  %v61_v46 = vld [vmem:[#allocation2 + $0x18] sm:$0xff]  ;;  %v2363_v50 = vld [vmem:[%s3072_s3 + $0x40] ss:$16 sps:$4 sm:$0xff]   ;;  %v2375_v52 = vld [vmem:[%s3072_s3 + $0x64] ss:$16 sps:$4 sm:$0xff]   ;;  %v105_v16 = vshrl.u32 %v3079_v15, 7 }
  0x25   :  { %v2356_v48 = vld [vmem:[%s3072_s3 + $0x4c] ss:$16 sps:$4 sm:$0xff]   ;;  %v67_v49 = vpack.c.bf16 %v61_v46, %v60_v45  ;;  %v2368_v51 = vld [vmem:[%s3072_s3 + $0x48] ss:$16 sps:$4 sm:$0xff]   ;;  %v2387_v54 = vld [vmem:[%s3072_s3 + $0x60] ss:$16 sps:$4 sm:$0xff]  }
  0x26   :  { %v2382_v53 = vld [vmem:[%s3072_s3 + $0x6c] ss:$16 sps:$4 sm:$0xff]   ;;  %v2392_v55 = vld [vmem:[%s3072_s3 + $0x68] ss:$16 sps:$4 sm:$0xff]   ;;  %v62_v56 = vld [vmem:[#allocation2 + $0x20] sm:$0xff]  ;;  %v114_v17 = vsub.s32 2, %v105_v16 }
  0x27   :  { %293 = vmatpush1.bf16.msra.mxu0 %v1880_v20  ;;  %366 = vmatpush1.bf16.msra.mxu1 %v1881_v21  ;;  %v63_v57 = vld [vmem:[#allocation2 + $0x28] sm:$0xff]  ;;  %v2401_v58 = vld [vmem:[%s3072_s3 + $0x84] ss:$16 sps:$4 sm:$0xff]   ;;  %v2413_v60 = vld [vmem:[%s3072_s3 + $0x80] ss:$16 sps:$4 sm:$0xff]   ;;  %v118_v18 = vsub.s32 3, %v105_v16 }
  0x28   :  { %294 = vmatprep.subr.bf16.mxu0 %v1882_v22  ;;  %367 = vmatprep.subr.bf16.mxu1 %v1884_v23  ;;  %v2406_v59 = vld [vmem:[%s3072_s3 + $0x8c] ss:$16 sps:$4 sm:$0xff]   ;;  %v2418_v61 = vld [vmem:[%s3072_s3 + $0x88] ss:$16 sps:$4 sm:$0xff]   ;;  %v68_v62 = vpack.c.bf16 %v63_v57, %v62_v56  ;;  %v2423_v63 = vld [vmem:[%s3072_s3 + $0xa4] ss:$16 sps:$4 sm:$0xff]  }
  0x29   :  { %v2428_v0 = vld [vmem:[%s3072_s3 + $0xac] ss:$16 sps:$4 sm:$0xff]   ;;  %v2437_v1 = vld [vmem:[%s3072_s3 + $0xa0] ss:$16 sps:$4 sm:$0xff]   ;;  %v2444_v2 = vld [vmem:[%s3072_s3 + $0xa8] ss:$16 sps:$4 sm:$0xff]  }
  0x2a   :  { %v64_v4 = vld [vmem:[#allocation2 + $0x30] sm:$0xff]  ;;  %v65_v5 = vld [vmem:[#allocation2 + $0x38] sm:$0xff]  ;;  %v106_v19 = vsub.s32 0, %v105_v16  ;;  %v102_v20 = vld [vmem:[%s3073_s4] sm:$0xf]  ;;  %v110_v21 = vsub.s32 1, %v105_v16 }
  0x2b   :  { %295 = vmatpush1.bf16.msra.mxu0 %v1886_v24  ;;  %368 = vmatpush1.bf16.msra.mxu1 %v1887_v25  ;;  %v2451_v6 = vld [vmem:[%s3072_s3 + $0xc4] ss:$16 sps:$4 sm:$0xff]   ;;  %v2456_v7 = vld [vmem:[%s3072_s3 + $0xcc] ss:$16 sps:$4 sm:$0xff]   ;;  %v69_v8 = vpack.c.bf16 %v65_v5, %v64_v4  ;;  %v2465_v9 = vld [vmem:[%s3072_s3 + $0xc0] ss:$16 sps:$4 sm:$0xff]   ;;  %v2544_v22 = vrot.slane %v102_v20, %v114_v17  ;;  %v2550_v25 = vrot.slane %v102_v20, %v118_v18 }
  0x2c   :  { %296 = vmatprep.subr.bf16.mxu0 %v1888_v26  ;;  %369 = vmatprep.subr.bf16.mxu1 %v1890_v27  ;;  %v2470_v10 = vld [vmem:[%s3072_s3 + $0xc8] ss:$16 sps:$4 sm:$0xff]   ;;  %v2477_v11 = vld [vmem:[%s3072_s3 + $0xe4] ss:$16 sps:$4 sm:$0xff]   ;;  %v2482_v12 = vld [vmem:[%s3072_s3 + $0xec] ss:$16 sps:$4 sm:$0xff]   ;;  %v107_v26 = vrot.slane %v102_v20, %v106_v19 }
  0x2d   :  { %v2489_v13 = vld [vmem:[%s3072_s3 + $0xe0] ss:$16 sps:$4 sm:$0xff]   ;;  %v2494_v14 = vld [vmem:[%s3072_s3 + $0xe8] ss:$16 sps:$4 sm:$0xff]  }
  0x2f   :  { %297 = vmatpush1.bf16.msra.mxu0 %v1892_v28  ;;  %370 = vmatpush1.bf16.msra.mxu1 %v1893_v29  ;;  %v111_v29 = vrot.slane %v102_v20, %v110_v21 }
  0x30   :  { %298 = vmatprep.subr.bf16.mxu0 %v1894_v30  ;;  %371 = vmatprep.subr.bf16.mxu1 %v1896_v31 }
  0x33   :  { %299 = vmatpush1.bf16.msra.mxu0 %v1898_v32  ;;  %372 = vmatpush1.bf16.msra.mxu1 %v1899_v33 }
  0x34   :  { %661 = vmatprep.subr.bf16.mxu0 %v2305_v36  ;;  %702 = vmatprep.subr.bf16.mxu1 %v2310_v37 }
  0x36   :  { %317 = vmatmul.mubr.bf16.vlgmr.msra.gmra.mrb[0].mxu0 %v66_v38  ;;  %390 = vmatmul.mubr.bf16.vlgmr.msra.gmra.mrb[0].mxu1 %v66_v38 }
  0x37   :  { %662 = vmatpush1.bf16.msra.mxu0 %v2315_v39  ;;  %703 = vmatpush1.bf16.msra.mxu1 %v2320_v40 }
  0x38   :  { %663 = vmatprep.subr.bf16.mxu0 %v2327_v41  ;;  %704 = vmatprep.subr.bf16.mxu1 %v2332_v42 }
  0x39   :  { %326 = vmatprep.mubr.bf16.mxu0 %v3080_v3  ;;  %399 = vmatprep.mubr.bf16.mxu1 %v3080_v3 }
  0x3b   :  { %664 = vmatpush1.bf16.msra.mxu0 %v2337_v43  ;;  %705 = vmatpush1.bf16.msra.mxu1 %v2342_v44 }
  0x3c   :  { %665 = vmatprep.subr.bf16.mxu0 %v2349_v47  ;;  %706 = vmatprep.subr.bf16.mxu1 %v2356_v48 }
  0x3e   :  { %327 = vmatmul.mubr.bf16.gmra.mrb[4].mxu0 %v67_v49  ;;  %400 = vmatmul.mubr.bf16.gmra.mrb[4].mxu1 %v67_v49 }
  0x3f   :  { %666 = vmatpush1.bf16.msra.mxu0 %v2363_v50  ;;  %707 = vmatpush1.bf16.msra.mxu1 %v2368_v51 }
  0x40   :  { %667 = vmatprep.subr.bf16.mxu0 %v2375_v52  ;;  %708 = vmatprep.subr.bf16.mxu1 %v2382_v53 }
  0x41   :  { %336 = vmatprep.mubr.bf16.mxu0 %v3080_v3  ;;  %409 = vmatprep.mubr.bf16.mxu1 %v3080_v3 }
  0x43   :  { %668 = vmatpush1.bf16.msra.mxu0 %v2387_v54  ;;  %709 = vmatpush1.bf16.msra.mxu1 %v2392_v55 }
  0x44   :  { %669 = vmatprep.subr.bf16.mxu0 %v2401_v58  ;;  %710 = vmatprep.subr.bf16.mxu1 %v2406_v59 }
  0x46   :  { %337 = vmatmul.mubr.bf16.gmra.mrb[8].mxu0 %v68_v62  ;;  %410 = vmatmul.mubr.bf16.gmra.mrb[8].mxu1 %v68_v62 }
  0x47   :  { %670 = vmatpush1.bf16.msra.mxu0 %v2413_v60  ;;  %711 = vmatpush1.bf16.msra.mxu1 %v2418_v61 }
  0x48   :  { %671 = vmatprep.subr.bf16.mxu0 %v2423_v63  ;;  %712 = vmatprep.subr.bf16.mxu1 %v2428_v0 }
  0x49   :  { %346 = vmatprep.mubr.bf16.mxu0 %v3080_v3  ;;  %419 = vmatprep.mubr.bf16.mxu1 %v3080_v3 }
  0x4b   :  { %672 = vmatpush1.bf16.msra.mxu0 %v2437_v1  ;;  %713 = vmatpush1.bf16.msra.mxu1 %v2444_v2 }
  0x4c   :  { %673 = vmatprep.subr.bf16.mxu0 %v2451_v6  ;;  %714 = vmatprep.subr.bf16.mxu1 %v2456_v7 }
  0x4e   :  { %347 = vmatmul.mubr.bf16.gmra.mrb[12].mxu0 %v69_v8  ;;  %420 = vmatmul.mubr.bf16.gmra.mrb[12].mxu1 %v69_v8 }
  0x4f   :  { %674 = vmatpush1.bf16.msra.mxu0 %v2465_v9  ;;  %715 = vmatpush1.bf16.msra.mxu1 %v2470_v10 }
  0x50   :  { %675 = vmatprep.subr.bf16.mxu0 %v2477_v11  ;;  %716 = vmatprep.subr.bf16.mxu1 %v2482_v12 }
  0x51   :  { %693 = vmatprep.mubr.bf16.mxu0 %v3080_v3  ;;  %734 = vmatprep.mubr.bf16.mxu1 %v3080_v3 }
  0x53   :  { %676 = vmatpush1.bf16.msra.mxu0 %v2489_v13  ;;  %717 = vmatpush1.bf16.msra.mxu1 %v2494_v14 }
  0x54   :  { %773 = vmatprep.subr.bf16.mxu0 %v2305_v36  ;;  %814 = vmatprep.subr.bf16.mxu1 %v2310_v37 }
  0x56   :  { %694 = vmatmul.mubr.bf16.vlgmr.msra.gmra.mrb[16].mxu0 %v3080_v3  ;;  %735 = vmatmul.mubr.bf16.vlgmr.msra.gmra.mrb[16].mxu1 %v3080_v3 }
  0x57   :  { %774 = vmatpush1.bf16.msra.mxu0 %v2315_v39  ;;  %815 = vmatpush1.bf16.msra.mxu1 %v2320_v40 }
  0x58   :  { %775 = vmatprep.subr.bf16.mxu0 %v2327_v41  ;;  %816 = vmatprep.subr.bf16.mxu1 %v2332_v42 }
  0x59   :  { %805 = vmatprep.mubr.bf16.mxu0 %v3080_v3  ;;  %846 = vmatprep.mubr.bf16.mxu1 %v3080_v3 }
  0x5b   :  { %776 = vmatpush1.bf16.msra.mxu0 %v2337_v43  ;;  %817 = vmatpush1.bf16.msra.mxu1 %v2342_v44 }
  0x5c   :  { %777 = vmatprep.subr.bf16.mxu0 %v2349_v47  ;;  %818 = vmatprep.subr.bf16.mxu1 %v2356_v48 }
  0x5f   :  { %778 = vmatpush1.bf16.msra.mxu0 %v2363_v50  ;;  %819 = vmatpush1.bf16.msra.mxu1 %v2368_v51 }
  0x60   :  { %779 = vmatprep.subr.bf16.mxu0 %v2375_v52  ;;  %820 = vmatprep.subr.bf16.mxu1 %v2382_v53 }
  0x63   :  { %780 = vmatpush1.bf16.msra.mxu0 %v2387_v54  ;;  %821 = vmatpush1.bf16.msra.mxu1 %v2392_v55 }
  0x64   :  { %781 = vmatprep.subr.bf16.mxu0 %v2401_v58  ;;  %822 = vmatprep.subr.bf16.mxu1 %v2406_v59 }
  0x67   :  { %782 = vmatpush1.bf16.msra.mxu0 %v2413_v60  ;;  %823 = vmatpush1.bf16.msra.mxu1 %v2418_v61 }
  0x68   :  { %783 = vmatprep.subr.bf16.mxu0 %v2423_v63  ;;  %824 = vmatprep.subr.bf16.mxu1 %v2428_v0 }
  0x6b   :  { %784 = vmatpush1.bf16.msra.mxu0 %v2437_v1  ;;  %825 = vmatpush1.bf16.msra.mxu1 %v2444_v2 }
  0x6c   :  { %785 = vmatprep.subr.bf16.mxu0 %v2451_v6  ;;  %826 = vmatprep.subr.bf16.mxu1 %v2456_v7 }
  0x6f   :  { %786 = vmatpush1.bf16.msra.mxu0 %v2465_v9  ;;  %827 = vmatpush1.bf16.msra.mxu1 %v2470_v10 }
  0x70   :  { %787 = vmatprep.subr.bf16.mxu0 %v2477_v11  ;;  %828 = vmatprep.subr.bf16.mxu1 %v2482_v12 }
  0x73   :  { %788 = vmatpush1.bf16.msra.mxu0 %v2489_v13  ;;  %829 = vmatpush1.bf16.msra.mxu1 %v2494_v14 }
  0x74   :  { %885 = vmatprep.subr.bf16.mxu0 %v2305_v36  ;;  %926 = vmatprep.subr.bf16.mxu1 %v2310_v37 }
 0x109   :  { %v2546_v23 = vpop.f32.mrb[0].mxu0  ;;  %v2548_v24 = vpop.f32.mrb[0].mxu1 }
 0x10a   :  { %v320_v27 = vpop.f32.mrb[1].mxu0  ;;  %v393_v28 = vpop.f32.mrb[1].mxu1 }
 0x10b   :  { %v322_v30 = vpop.f32.mrb[2].mxu0  ;;  %v395_v31 = vpop.f32.mrb[2].mxu1 }
 0x10c   :  { %v2552_v32 = vadd.f32 %v322_v30, %v107_v26  ;;  %v324_v33 = vpop.f32.mrb[3].mxu0  ;;  %v2555_v34 = vadd.f32 %v395_v31, %v2544_v22  ;;  %v397_v35 = vpop.f32.mrb[3].mxu1 }
 0x10d   :  { %v2557_v38 = vadd.f32 %v324_v33, %v111_v29  ;;  %v2560_v45 = vadd.f32 %v397_v35, %v2550_v25 }
 0x111   :  { %v328_v46 = vpop.f32.mrb[4].mxu0  ;;  %v401_v49 = vpop.f32.mrb[4].mxu1 }
 0x112   :  { %v2562_v56 = vadd.f32 %v328_v46, %v107_v26  ;;  %v330_v57 = vpop.f32.mrb[5].mxu0  ;;  %v2565_v62 = vadd.f32 %v401_v49, %v2544_v22  ;;  %v403_v4 = vpop.f32.mrb[5].mxu1 }
 0x113   :  { %v2567_v5 = vadd.f32 %v330_v57, %v111_v29  ;;  %v332_v8 = vpop.f32.mrb[6].mxu0  ;;  %v2570_v16 = vadd.f32 %v403_v4, %v2550_v25  ;;  %v405_v17 = vpop.f32.mrb[6].mxu1 }
 0x114   :  { %v2572_v18 = vadd.f32 %v332_v8, %v107_v26  ;;  %v334_v19 = vpop.f32.mrb[7].mxu0  ;;  %v2575_v20 = vadd.f32 %v405_v17, %v2544_v22  ;;  %v407_v21 = vpop.f32.mrb[7].mxu1 }
 0x115   :  { %3082 = vst [vmem:[#allocation13_spill] sm:$0xff] %v2570_v16  ;;  %v2577_v30 = vadd.f32 %v334_v19, %v111_v29  ;;  %v2580_v31 = vadd.f32 %v407_v21, %v2550_v25 }
 0x116   :  { %3083 = vst [vmem:[#allocation14_spill] sm:$0xff] %v2572_v18  ;;  %3084 = vst [vmem:[#allocation15_spill] sm:$0xff] %v2575_v20 }
 0x117   :  { %3085 = vst [vmem:[#allocation16_spill] sm:$0xff] %v2577_v30  ;;  %3086 = vst [vmem:[#allocation17_spill] sm:$0xff] %v2580_v31 }
 0x119   :  { %v338_v33 = vpop.f32.mrb[8].mxu0  ;;  %v411_v35 = vpop.f32.mrb[8].mxu1 }
 0x11a   :  { %v2582_v46 = vadd.f32 %v338_v33, %v107_v26  ;;  %v340_v49 = vpop.f32.mrb[9].mxu0  ;;  %v2585_v57 = vadd.f32 %v411_v35, %v2544_v22  ;;  %v413_v4 = vpop.f32.mrb[9].mxu1 }
 0x11b   :  { %v2587_v8 = vadd.f32 %v340_v49, %v111_v29  ;;  %v342_v15 = vpop.f32.mrb[10].mxu0  ;;  %v2590_v17 = vadd.f32 %v413_v4, %v2550_v25  ;;  %v415_v19 = vpop.f32.mrb[10].mxu1 }
 0x11c   :  { %3087 = vst [vmem:[#allocation18_spill] sm:$0xff] %v2582_v46  ;;  %3088 = vst [vmem:[#allocation19_spill] sm:$0xff] %v2585_v57  ;;  %v2592_v3 = vadd.f32 %v342_v15, %v107_v26  ;;  %v344_v21 = vpop.f32.mrb[11].mxu0  ;;  %v2595_v31 = vadd.f32 %v415_v19, %v2544_v22  ;;  %v417_v33 = vpop.f32.mrb[11].mxu1 }
 0x11d   :  { %3089 = vst [vmem:[#allocation20_spill] sm:$0xff] %v2587_v8  ;;  %3090 = vst [vmem:[#allocation21_spill] sm:$0xff] %v2590_v17  ;;  %v2597_v46 = vadd.f32 %v344_v21, %v111_v29  ;;  %v2600_v35 = vadd.f32 %v417_v33, %v2550_v25 }
 0x11e   :  { %3091 = vst [vmem:[#allocation22_spill] sm:$0xff] %v2592_v3  ;;  %3092 = vst [vmem:[#allocation23_spill] sm:$0xff] %v2595_v31 }
 0x11f   :  { %3093 = vst [vmem:[#allocation24_spill] sm:$0xff] %v2597_v46  ;;  %3094 = vst [vmem:[#allocation25_spill] sm:$0xff] %v2600_v35 }
 0x121   :  { %v348_v57 = vpop.f32.mrb[12].mxu0  ;;  %v421_v49 = vpop.f32.mrb[12].mxu1 }
 0x122   :  { %v2602_v8 = vadd.f32 %v348_v57, %v107_v26  ;;  %v350_v30 = vpop.f32.mrb[13].mxu0  ;;  %v2605_v4 = vadd.f32 %v421_v49, %v2544_v22  ;;  %v423_v15 = vpop.f32.mrb[13].mxu1 }
 0x123   :  { %v2607_v3 = vadd.f32 %v350_v30, %v111_v29  ;;  %v352_v17 = vpop.f32.mrb[14].mxu0  ;;  %v2610_v19 = vadd.f32 %v423_v15, %v2550_v25  ;;  %v425_v21 = vpop.f32.mrb[14].mxu1  ;;  %v319_v30 = vadd.f32 %v2546_v23, %v107_v26  ;;  %v321_v15 = vadd.f32 %v320_v27, %v111_v29 }
 0x124   :  { %3095 = vst [vmem:[#allocation26_spill] sm:$0xff] %v2602_v8  ;;  %3096 = vst [vmem:[#allocation27_spill] sm:$0xff] %v2605_v4  ;;  %v2612_v46 = vadd.f32 %v352_v17, %v107_v26  ;;  %v354_v33 = vpop.f32.mrb[15].mxu0  ;;  %v2615_v35 = vadd.f32 %v425_v21, %v2544_v22  ;;  %v427_v57 = vpop.f32.mrb[15].mxu1 }
 0x125   :  { %3097 = vst [vmem:[#allocation28_spill] sm:$0xff] %v2607_v3  ;;  %3098 = vst [vmem:[#allocation29_spill] sm:$0xff] %v2610_v19  ;;  %v2617_v8 = vadd.f32 %v354_v33, %v111_v29  ;;  %v2620_v49 = vadd.f32 %v427_v57, %v2550_v25  ;;  %v392_v3 = vadd.f32 %v2548_v24, %v2544_v22 }
 0x126   :  { %3099 = vst [vmem:[#allocation30_spill] sm:$0xff] %v2612_v46  ;;  %3100 = vst [vmem:[#allocation31_spill] sm:$0xff] %v2615_v35  ;;  %v394_v19 = vadd.f32 %v393_v28, %v2550_v25 }
 0x127   :  { %3101 = vst [vmem:[#allocation32_spill] sm:$0xff] %v2617_v8  ;;  %3102 = vst [vmem:[#allocation33_spill] sm:$0xff] %v2620_v49 }
 0x129   :  { %v695_v17 = vpop.f32.mrb[16].mxu0  ;;  %v736_v46 = vpop.f32.mrb[16].mxu1 }
 0x12a   :  { %v743_v4 = vadd.f32 %v695_v17, %v319_v30  ;;  %v745_v31 = vadd.f32 %v736_v46, %v392_v3  ;;  %v697_v21 = vpop.f32.mrb[17].mxu0  ;;  %v738_v35 = vpop.f32.mrb[17].mxu1 }
 0x12b   :  { %v744_v20 = vadd.f32 %v697_v21, %v321_v15  ;;  %v746_v33 = vadd.f32 %v738_v35, %v394_v19  ;;  %v699_v8 = vpop.f32.mrb[18].mxu0  ;;  %v740_v18 = vpop.f32.mrb[18].mxu1 }
 0x12c   :  { %v747_v57 = vmul.f32 0.5, %v743_v4  ;;  %v700_v49 = vpop.f32.mrb[19].mxu0  ;;  %v741_v16 = vpop.f32.mrb[19].mxu1  ;;  %v749_v22 = vmul.f32 0.5, %v745_v31 }
 0x12d   :  { %v748_v23 = vmul.f32 0.5, %v744_v20  ;;  %v3103_v49 = vmov 0  }
 0x12e   :  { %1956 = vtanh.f32 %v747_v57 }
 0x12f   :  { %1958 = vtanh.f32 %v748_v23 }
 0x130   :  { %1960 = vtanh.f32 %v746_v33 }
 0x131   :  { %1962 = vtanh.f32 %v749_v22 }
 0x138   :  { %v1957_v24 = vpop.eup %1956 }
 0x139   :  { %v753_v25 = vmul.f32 0.5, %v1957_v24  ;;  %v1959_v26 = vpop.eup %1958 }
 0x13a   :  { %v754_v3 = vmul.f32 0.5, %v1959_v26  ;;  %v1961_v28 = vpop.eup %1960 }
 0x13b   :  { %v756_v27 = vadd.f32 0.5, %v753_v25  ;;  %v1963_v16 = vpop.eup %1962 }
 0x13c   :  { %v757_v29 = vadd.f32 0.5, %v754_v3  ;;  %v755_v18 = vmul.f32 0.5, %v1963_v16 }
 0x13d   :  { %v761_v46 = vmul.f32 %v1961_v28, %v756_v27 }
 0x13e   :  { %v760_v35 = vmul.f32 0.0, %v757_v29  ;;  %v758_v20 = vadd.f32 0.5, %v755_v18 }
 0x140   :  { %v2626_v8 = vadd.f32 %v761_v46, %v760_v35 }
 0x142   :  { %1964 = vtanh.f32 %v2626_v8 }
 0x14c   :  { %v1965_v4 = vpop.eup %1964 }
 0x14d   :  { %v764_v19 = vmul.f32 %v1965_v4, %v758_v20 }
 0x14f   :  { %v772_v31 = vpack.c.bf16 %v764_v19, %v764_v19 }
 0x151   :  { %806 = vmatmul.mubr.bf16.vlgmr.msra.gmra.mrb[20].mxu0 %v772_v31  ;;  %847 = vmatmul.mubr.bf16.vlgmr.msra.gmra.mrb[20].mxu1 %v772_v31 }
 0x152   :  { %886 = vmatpush1.bf16.msra.mxu0 %v2315_v39  ;;  %927 = vmatpush1.bf16.msra.mxu1 %v2320_v40 }
 0x153   :  { %887 = vmatprep.subr.bf16.mxu0 %v2327_v41  ;;  %928 = vmatprep.subr.bf16.mxu1 %v2332_v42 }
 0x154   :  { %917 = vmatprep.mubr.bf16.mxu0 %v3103_v49  ;;  %958 = vmatprep.mubr.bf16.mxu1 %v3103_v49 }
 0x156   :  { %888 = vmatpush1.bf16.msra.mxu0 %v2337_v43  ;;  %929 = vmatpush1.bf16.msra.mxu1 %v2342_v44 }
 0x157   :  { %889 = vmatprep.subr.bf16.mxu0 %v2349_v47  ;;  %930 = vmatprep.subr.bf16.mxu1 %v2356_v48 }
 0x15a   :  { %890 = vmatpush1.bf16.msra.mxu0 %v2363_v50  ;;  %931 = vmatpush1.bf16.msra.mxu1 %v2368_v51 }
 0x15b   :  { %891 = vmatprep.subr.bf16.mxu0 %v2375_v52  ;;  %932 = vmatprep.subr.bf16.mxu1 %v2382_v53 }
 0x15e   :  { %892 = vmatpush1.bf16.msra.mxu0 %v2387_v54  ;;  %933 = vmatpush1.bf16.msra.mxu1 %v2392_v55 }
 0x15f   :  { %893 = vmatprep.subr.bf16.mxu0 %v2401_v58  ;;  %934 = vmatprep.subr.bf16.mxu1 %v2406_v59 }
 0x162   :  { %894 = vmatpush1.bf16.msra.mxu0 %v2413_v60  ;;  %935 = vmatpush1.bf16.msra.mxu1 %v2418_v61 }
 0x163   :  { %895 = vmatprep.subr.bf16.mxu0 %v2423_v63  ;;  %936 = vmatprep.subr.bf16.mxu1 %v2428_v0 }
 0x166   :  { %896 = vmatpush1.bf16.msra.mxu0 %v2437_v1  ;;  %937 = vmatpush1.bf16.msra.mxu1 %v2444_v2 }
 0x167   :  { %897 = vmatprep.subr.bf16.mxu0 %v2451_v6  ;;  %938 = vmatprep.subr.bf16.mxu1 %v2456_v7 }
 0x16a   :  { %898 = vmatpush1.bf16.msra.mxu0 %v2465_v9  ;;  %939 = vmatpush1.bf16.msra.mxu1 %v2470_v10 }
 0x16b   :  { %899 = vmatprep.subr.bf16.mxu0 %v2477_v11  ;;  %940 = vmatprep.subr.bf16.mxu1 %v2482_v12 }
 0x16e   :  { %900 = vmatpush1.bf16.msra.mxu0 %v2489_v13  ;;  %941 = vmatpush1.bf16.msra.mxu1 %v2494_v14 }
 0x16f   :  { %997 = vmatprep.subr.bf16.mxu0 %v2305_v36  ;;  %1038 = vmatprep.subr.bf16.mxu1 %v2310_v37 }
 0x224   :  { %v807_v30 = vpop.f32.mrb[20].mxu0  ;;  %v848_v15 = vpop.f32.mrb[20].mxu1 }
 0x225   :  { %v855_v17 = vadd.f32 %v807_v30, %v2552_v32  ;;  %v857_v21 = vadd.f32 %v848_v15, %v2555_v34  ;;  %v809_v33 = vpop.f32.mrb[21].mxu0  ;;  %v850_v57 = vpop.f32.mrb[21].mxu1 }
 0x226   :  { %v856_v23 = vadd.f32 %v809_v33, %v2557_v38  ;;  %v858_v22 = vadd.f32 %v850_v57, %v2560_v45  ;;  %v811_v24 = vpop.f32.mrb[22].mxu0  ;;  %v852_v25 = vpop.f32.mrb[22].mxu1 }
 0x227   :  { %v859_v26 = vmul.f32 0.5, %v855_v17  ;;  %v812_v27 = vpop.f32.mrb[23].mxu0  ;;  %v853_v3 = vpop.f32.mrb[23].mxu1  ;;  %v861_v29 = vmul.f32 0.5, %v857_v21 }
 0x228   :  { %v860_v28 = vmul.f32 0.5, %v856_v23 }
 0x229   :  { %1966 = vtanh.f32 %v859_v26  ;;  %v3104_v26 = vld [vmem:[#allocation13_spill] sm:$0xff] }
 0x22a   :  { %1968 = vtanh.f32 %v860_v28 }
 0x22b   :  { %1970 = vtanh.f32 %v858_v22 }
 0x22c   :  { %1972 = vtanh.f32 %v861_v29 }
 0x233   :  { %v1967_v46 = vpop.eup %1966 }
 0x234   :  { %v865_v32 = vmul.f32 0.5, %v1967_v46  ;;  %v1969_v35 = vpop.eup %1968 }
 0x235   :  { %v866_v16 = vmul.f32 0.5, %v1969_v35  ;;  %v1971_v18 = vpop.eup %1970 }
 0x236   :  { %v868_v34 = vadd.f32 0.5, %v865_v32  ;;  %v1973_v19 = vpop.eup %1972 }
 0x237   :  { %v869_v38 = vadd.f32 0.5, %v866_v16  ;;  %v867_v31 = vmul.f32 0.5, %v1973_v19 }
 0x238   :  { %v873_v20 = vmul.f32 %v1971_v18, %v868_v34 }
 0x239   :  { %v872_v45 = vmul.f32 %v869_v38, %v2626_v8  ;;  %v870_v30 = vadd.f32 0.5, %v867_v31 }
 0x23b   :  { %v2668_v4 = vadd.f32 %v873_v20, %v872_v45 }
 0x23d   :  { %1974 = vtanh.f32 %v2668_v4 }
 0x247   :  { %v1975_v15 = vpop.eup %1974 }
 0x248   :  { %v876_v17 = vmul.f32 %v1975_v15, %v870_v30 }
 0x24a   :  { %v884_v21 = vpack.c.bf16 %v876_v17, %v876_v17 }
 0x24c   :  { %918 = vmatmul.mubr.bf16.vlgmr.msra.gmra.mrb[24].mxu0 %v884_v21  ;;  %959 = vmatmul.mubr.bf16.vlgmr.msra.gmra.mrb[24].mxu1 %v884_v21 }
 0x24d   :  { %998 = vmatpush1.bf16.msra.mxu0 %v2315_v39  ;;  %1039 = vmatpush1.bf16.msra.mxu1 %v2320_v40 }
 0x24e   :  { %999 = vmatprep.subr.bf16.mxu0 %v2327_v41  ;;  %1040 = vmatprep.subr.bf16.mxu1 %v2332_v42 }
 0x24f   :  { %1029 = vmatprep.mubr.bf16.mxu0 %v3103_v49  ;;  %1070 = vmatprep.mubr.bf16.mxu1 %v3103_v49 }
 0x251   :  { %1000 = vmatpush1.bf16.msra.mxu0 %v2337_v43  ;;  %1041 = vmatpush1.bf16.msra.mxu1 %v2342_v44 }
 0x252   :  { %1001 = vmatprep.subr.bf16.mxu0 %v2349_v47  ;;  %1042 = vmatprep.subr.bf16.mxu1 %v2356_v48 }
 0x255   :  { %1002 = vmatpush1.bf16.msra.mxu0 %v2363_v50  ;;  %1043 = vmatpush1.bf16.msra.mxu1 %v2368_v51 }
 0x256   :  { %1003 = vmatprep.subr.bf16.mxu0 %v2375_v52  ;;  %1044 = vmatprep.subr.bf16.mxu1 %v2382_v53 }
 0x259   :  { %1004 = vmatpush1.bf16.msra.mxu0 %v2387_v54  ;;  %1045 = vmatpush1.bf16.msra.mxu1 %v2392_v55 }
 0x25a   :  { %1005 = vmatprep.subr.bf16.mxu0 %v2401_v58  ;;  %1046 = vmatprep.subr.bf16.mxu1 %v2406_v59 }
 0x25d   :  { %1006 = vmatpush1.bf16.msra.mxu0 %v2413_v60  ;;  %1047 = vmatpush1.bf16.msra.mxu1 %v2418_v61 }
 0x25e   :  { %1007 = vmatprep.subr.bf16.mxu0 %v2423_v63  ;;  %1048 = vmatprep.subr.bf16.mxu1 %v2428_v0 }
 0x261   :  { %1008 = vmatpush1.bf16.msra.mxu0 %v2437_v1  ;;  %1049 = vmatpush1.bf16.msra.mxu1 %v2444_v2 }
 0x262   :  { %1009 = vmatprep.subr.bf16.mxu0 %v2451_v6  ;;  %1050 = vmatprep.subr.bf16.mxu1 %v2456_v7 }
 0x265   :  { %1010 = vmatpush1.bf16.msra.mxu0 %v2465_v9  ;;  %1051 = vmatpush1.bf16.msra.mxu1 %v2470_v10 }
 0x266   :  { %1011 = vmatprep.subr.bf16.mxu0 %v2477_v11  ;;  %1052 = vmatprep.subr.bf16.mxu1 %v2482_v12 }
 0x269   :  { %1012 = vmatpush1.bf16.msra.mxu0 %v2489_v13  ;;  %1053 = vmatpush1.bf16.msra.mxu1 %v2494_v14 }
 0x26a   :  { %1109 = vmatprep.subr.bf16.mxu0 %v2305_v36  ;;  %1150 = vmatprep.subr.bf16.mxu1 %v2310_v37 }
 0x31f   :  { %v919_v8 = vpop.f32.mrb[24].mxu0  ;;  %v960_v33 = vpop.f32.mrb[24].mxu1 }
 0x320   :  { %v967_v57 = vadd.f32 %v919_v8, %v2562_v56  ;;  %v969_v23 = vadd.f32 %v960_v33, %v2565_v62  ;;  %v921_v22 = vpop.f32.mrb[25].mxu0  ;;  %v962_v24 = vpop.f32.mrb[25].mxu1 }
 0x321   :  { %v968_v25 = vadd.f32 %v921_v22, %v2567_v5  ;;  %v970_v27 = vadd.f32 %v962_v24, %v3104_v26  ;;  %v923_v3 = vpop.f32.mrb[26].mxu0  ;;  %v964_v28 = vpop.f32.mrb[26].mxu1  ;;  %v3106_v24 = vld [vmem:[#allocation15_spill] sm:$0xff] }
 0x322   :  { %v971_v29 = vmul.f32 0.5, %v967_v57  ;;  %v924_v46 = vpop.f32.mrb[27].mxu0  ;;  %v965_v32 = vpop.f32.mrb[27].mxu1  ;;  %v973_v34 = vmul.f32 0.5, %v969_v23  ;;  %v3105_v23 = vld [vmem:[#allocation14_spill] sm:$0xff]  ;;  %v3107_v3 = vld [vmem:[#allocation16_spill] sm:$0xff] }
 0x323   :  { %v972_v35 = vmul.f32 0.5, %v968_v25 }
 0x324   :  { %1976 = vtanh.f32 %v971_v29  ;;  %v3108_v29 = vld [vmem:[#allocation17_spill] sm:$0xff] }
 0x325   :  { %1978 = vtanh.f32 %v972_v35 }
 0x326   :  { %1980 = vtanh.f32 %v970_v27 }
 0x327   :  { %1982 = vtanh.f32 %v973_v34 }
 0x32e   :  { %v1977_v16 = vpop.eup %1976 }
 0x32f   :  { %v977_v56 = vmul.f32 0.5, %v1977_v16  ;;  %v1979_v18 = vpop.eup %1978 }
 0x330   :  { %v978_v38 = vmul.f32 0.5, %v1979_v18  ;;  %v1981_v20 = vpop.eup %1980 }
 0x331   :  { %v980_v62 = vadd.f32 0.5, %v977_v56  ;;  %v1983_v30 = vpop.eup %1982 }
 0x332   :  { %v981_v5 = vadd.f32 0.5, %v978_v38  ;;  %v979_v15 = vmul.f32 0.5, %v1983_v30 }
 0x333   :  { %v985_v45 = vmul.f32 %v1981_v20, %v980_v62 }
 0x334   :  { %v984_v19 = vmul.f32 %v981_v5, %v2668_v4  ;;  %v982_v17 = vadd.f32 0.5, %v979_v15 }
 0x336   :  { %v2710_v31 = vadd.f32 %v985_v45, %v984_v19 }
 0x338   :  { %1984 = vtanh.f32 %v2710_v31 }
 0x342   :  { %v1985_v21 = vpop.eup %1984 }
 0x343   :  { %v988_v8 = vmul.f32 %v1985_v21, %v982_v17 }
 0x345   :  { %v996_v33 = vpack.c.bf16 %v988_v8, %v988_v8 }
 0x347   :  { %1030 = vmatmul.mubr.bf16.vlgmr.msra.gmra.mrb[28].mxu0 %v996_v33  ;;  %1071 = vmatmul.mubr.bf16.vlgmr.msra.gmra.mrb[28].mxu1 %v996_v33 }
 0x348   :  { %1110 = vmatpush1.bf16.msra.mxu0 %v2315_v39  ;;  %1151 = vmatpush1.bf16.msra.mxu1 %v2320_v40 }
 0x349   :  { %1111 = vmatprep.subr.bf16.mxu0 %v2327_v41  ;;  %1152 = vmatprep.subr.bf16.mxu1 %v2332_v42 }
 0x34a   :  { %1141 = vmatprep.mubr.bf16.mxu0 %v3103_v49  ;;  %1182 = vmatprep.mubr.bf16.mxu1 %v3103_v49 }
 0x34c   :  { %1112 = vmatpush1.bf16.msra.mxu0 %v2337_v43  ;;  %1153 = vmatpush1.bf16.msra.mxu1 %v2342_v44 }
 0x34d   :  { %1113 = vmatprep.subr.bf16.mxu0 %v2349_v47  ;;  %1154 = vmatprep.subr.bf16.mxu1 %v2356_v48 }
 0x350   :  { %1114 = vmatpush1.bf16.msra.mxu0 %v2363_v50  ;;  %1155 = vmatpush1.bf16.msra.mxu1 %v2368_v51 }
 0x351   :  { %1115 = vmatprep.subr.bf16.mxu0 %v2375_v52  ;;  %1156 = vmatprep.subr.bf16.mxu1 %v2382_v53 }
 0x354   :  { %1116 = vmatpush1.bf16.msra.mxu0 %v2387_v54  ;;  %1157 = vmatpush1.bf16.msra.mxu1 %v2392_v55 }
 0x355   :  { %1117 = vmatprep.subr.bf16.mxu0 %v2401_v58  ;;  %1158 = vmatprep.subr.bf16.mxu1 %v2406_v59 }
 0x358   :  { %1118 = vmatpush1.bf16.msra.mxu0 %v2413_v60  ;;  %1159 = vmatpush1.bf16.msra.mxu1 %v2418_v61 }
 0x359   :  { %1119 = vmatprep.subr.bf16.mxu0 %v2423_v63  ;;  %1160 = vmatprep.subr.bf16.mxu1 %v2428_v0 }
 0x35c   :  { %1120 = vmatpush1.bf16.msra.mxu0 %v2437_v1  ;;  %1161 = vmatpush1.bf16.msra.mxu1 %v2444_v2 }
 0x35d   :  { %1121 = vmatprep.subr.bf16.mxu0 %v2451_v6  ;;  %1162 = vmatprep.subr.bf16.mxu1 %v2456_v7 }
 0x360   :  { %1122 = vmatpush1.bf16.msra.mxu0 %v2465_v9  ;;  %1163 = vmatpush1.bf16.msra.mxu1 %v2470_v10 }
 0x361   :  { %1123 = vmatprep.subr.bf16.mxu0 %v2477_v11  ;;  %1164 = vmatprep.subr.bf16.mxu1 %v2482_v12 }
 0x364   :  { %1124 = vmatpush1.bf16.msra.mxu0 %v2489_v13  ;;  %1165 = vmatpush1.bf16.msra.mxu1 %v2494_v14 }
 0x365   :  { %1221 = vmatprep.subr.bf16.mxu0 %v2305_v36  ;;  %1262 = vmatprep.subr.bf16.mxu1 %v2310_v37 }
 0x41a   :  { %v1031_v4 = vpop.f32.mrb[28].mxu0  ;;  %v1072_v57 = vpop.f32.mrb[28].mxu1 }
 0x41b   :  { %v1079_v22 = vadd.f32 %v1031_v4, %v3105_v23  ;;  %v1081_v25 = vadd.f32 %v1072_v57, %v3106_v24  ;;  %v1033_v26 = vpop.f32.mrb[29].mxu0  ;;  %v1074_v27 = vpop.f32.mrb[29].mxu1 }
 0x41c   :  { %v1080_v28 = vadd.f32 %v1033_v26, %v3107_v3  ;;  %v1082_v46 = vadd.f32 %v1074_v27, %v3108_v29  ;;  %v1035_v32 = vpop.f32.mrb[30].mxu0  ;;  %v1076_v35 = vpop.f32.mrb[30].mxu1 }
 0x41d   :  { %v1083_v34 = vmul.f32 0.5, %v1079_v22  ;;  %v1036_v16 = vpop.f32.mrb[31].mxu0  ;;  %v1077_v56 = vpop.f32.mrb[31].mxu1  ;;  %v1085_v37 = vmul.f32 0.5, %v1081_v25 }
 0x41e   :  { %v1084_v36 = vmul.f32 0.5, %v1080_v28 }
 0x41f   :  { %1986 = vtanh.f32 %v1083_v34 }
 0x420   :  { %1988 = vtanh.f32 %v1084_v36 }
 0x421   :  { %1990 = vtanh.f32 %v1082_v46 }
 0x422   :  { %1992 = vtanh.f32 %v1085_v37 }
 0x429   :  { %v1987_v18 = vpop.eup %1986 }
 0x42a   :  { %v1089_v62 = vmul.f32 0.5, %v1987_v18  ;;  %v1989_v38 = vpop.eup %1988  ;;  %v2810_v18 = vld [vmem:[%s3072_s3] ss:$16 sps:$4 sm:$0xff]  }
 0x42b   :  { %v1090_v5 = vmul.f32 0.5, %v1989_v38  ;;  %v1991_v45 = vpop.eup %1990  ;;  %v2822_v38 = vld [vmem:[%s3072_s3 + $0x24] ss:$16 sps:$4 sm:$0xff]  }
 0x42c   :  { %v1092_v20 = vadd.f32 0.5, %v1089_v62  ;;  %v1993_v21 = vpop.eup %1992  ;;  %v2816_v62 = vld [vmem:[%s3072_s3 + $0x8] ss:$16 sps:$4 sm:$0xff]  }
 0x42d   :  { %v1093_v19 = vadd.f32 0.5, %v1090_v5  ;;  %v1091_v8 = vmul.f32 0.5, %v1993_v21  ;;  %v2836_v5 = vld [vmem:[%s3072_s3 + $0x20] ss:$16 sps:$4 sm:$0xff]   ;;  %v2872_v21 = vld [vmem:[%s3072_s3 + $0x64] ss:$16 sps:$4 sm:$0xff]  }
 0x42e   :  { %v1097_v30 = vmul.f32 %v1991_v45, %v1092_v20  ;;  %v2828_v20 = vld [vmem:[%s3072_s3 + $0x2c] ss:$16 sps:$4 sm:$0xff]   ;;  %v2842_v45 = vld [vmem:[%s3072_s3 + $0x28] ss:$16 sps:$4 sm:$0xff]  }
 0x42f   :  { %v1096_v15 = vmul.f32 %v1093_v19, %v2710_v31  ;;  %v1094_v33 = vadd.f32 0.5, %v1091_v8  ;;  %v2848_v19 = vld [vmem:[%s3072_s3 + $0x44] ss:$16 sps:$4 sm:$0xff]   ;;  %v2878_v8 = vld [vmem:[%s3072_s3 + $0x6c] ss:$16 sps:$4 sm:$0xff]  }
 0x431   :  { %v2752_v17 = vadd.f32 %v1097_v30, %v1096_v15  ;;  %v2854_v30 = vld [vmem:[%s3072_s3 + $0x4c] ss:$16 sps:$4 sm:$0xff]   ;;  %v2860_v15 = vld [vmem:[%s3072_s3 + $0x40] ss:$16 sps:$4 sm:$0xff]  }
 0x433   :  { %1994 = vtanh.f32 %v2752_v17 }
 0x43d   :  { %v1995_v4 = vpop.eup %1994 }
 0x43e   :  { %v1100_v57 = vmul.f32 %v1995_v4, %v1094_v33  ;;  %v2884_v33 = vld [vmem:[%s3072_s3 + $0x60] ss:$16 sps:$4 sm:$0xff]   ;;  %v2890_v4 = vld [vmem:[%s3072_s3 + $0x68] ss:$16 sps:$4 sm:$0xff]  }
 0x440   :  { %v1108_v23 = vpack.c.bf16 %v1100_v57, %v1100_v57  ;;  %v2896_v57 = vld [vmem:[%s3072_s3 + $0x84] ss:$16 sps:$4 sm:$0xff]  }
 0x442   :  { %1142 = vmatmul.mubr.bf16.vlgmr.msra.gmra.mrb[32].mxu0 %v1108_v23  ;;  %1183 = vmatmul.mubr.bf16.vlgmr.msra.gmra.mrb[32].mxu1 %v1108_v23  ;;  %v2902_v23 = vld [vmem:[%s3072_s3 + $0x8c] ss:$16 sps:$4 sm:$0xff]  }
 0x443   :  { %1222 = vmatpush1.bf16.msra.mxu0 %v2315_v39  ;;  %1263 = vmatpush1.bf16.msra.mxu1 %v2320_v40  ;;  %v2790_v39 = vld [vmem:[%s3072_s3 + $0x4] ss:$16 sps:$4 sm:$0xff]   ;;  %v2796_v40 = vld [vmem:[%s3072_s3 + $0xc] ss:$16 sps:$4 sm:$0xff]  }
 0x444   :  { %1223 = vmatprep.subr.bf16.mxu0 %v2327_v41  ;;  %1264 = vmatprep.subr.bf16.mxu1 %v2332_v42 }
 0x445   :  { %1253 = vmatprep.mubr.bf16.mxu0 %v3103_v49  ;;  %1294 = vmatprep.mubr.bf16.mxu1 %v3103_v49 }
 0x447   :  { %1224 = vmatpush1.bf16.msra.mxu0 %v2337_v43  ;;  %1265 = vmatpush1.bf16.msra.mxu1 %v2342_v44  ;;  %v3109_v43 = vld [vmem:[#allocation18_spill] sm:$0xff] }
 0x448   :  { %1225 = vmatprep.subr.bf16.mxu0 %v2349_v47  ;;  %1266 = vmatprep.subr.bf16.mxu1 %v2356_v48  ;;  %v3110_v47 = vld [vmem:[#allocation19_spill] sm:$0xff] }
 0x44b   :  { %1226 = vmatpush1.bf16.msra.mxu0 %v2363_v50  ;;  %1267 = vmatpush1.bf16.msra.mxu1 %v2368_v51 }
 0x44c   :  { %1227 = vmatprep.subr.bf16.mxu0 %v2375_v52  ;;  %1268 = vmatprep.subr.bf16.mxu1 %v2382_v53  ;;  %v3111_v52 = vld [vmem:[#allocation20_spill] sm:$0xff] }
 0x44f   :  { %1228 = vmatpush1.bf16.msra.mxu0 %v2387_v54  ;;  %1269 = vmatpush1.bf16.msra.mxu1 %v2392_v55  ;;  %v3112_v54 = vld [vmem:[#allocation21_spill] sm:$0xff] }
 0x450   :  { %1229 = vmatprep.subr.bf16.mxu0 %v2401_v58  ;;  %1270 = vmatprep.subr.bf16.mxu1 %v2406_v59 }
 0x453   :  { %1230 = vmatpush1.bf16.msra.mxu0 %v2413_v60  ;;  %1271 = vmatpush1.bf16.msra.mxu1 %v2418_v61 }
 0x454   :  { %1231 = vmatprep.subr.bf16.mxu0 %v2423_v63  ;;  %1272 = vmatprep.subr.bf16.mxu1 %v2428_v0 }
 0x457   :  { %1232 = vmatpush1.bf16.msra.mxu0 %v2437_v1  ;;  %1273 = vmatpush1.bf16.msra.mxu1 %v2444_v2 }
 0x458   :  { %1233 = vmatprep.subr.bf16.mxu0 %v2451_v6  ;;  %1274 = vmatprep.subr.bf16.mxu1 %v2456_v7 }
 0x45b   :  { %1234 = vmatpush1.bf16.msra.mxu0 %v2465_v9  ;;  %1275 = vmatpush1.bf16.msra.mxu1 %v2470_v10 }
 0x45c   :  { %1235 = vmatprep.subr.bf16.mxu0 %v2477_v11  ;;  %1276 = vmatprep.subr.bf16.mxu1 %v2482_v12 }
 0x45f   :  { %1236 = vmatpush1.bf16.msra.mxu0 %v2489_v13  ;;  %1277 = vmatpush1.bf16.msra.mxu1 %v2494_v14 }
 0x460   :  { %1333 = vmatprep.subr.bf16.mxu0 %v2790_v39  ;;  %1374 = vmatprep.subr.bf16.mxu1 %v2796_v40 }
 0x515   :  { %v1143_v41 = vpop.f32.mrb[32].mxu0  ;;  %v1184_v42 = vpop.f32.mrb[32].mxu1 }
 0x516   :  { %v1191_v44 = vadd.f32 %v1143_v41, %v3109_v43  ;;  %v1193_v48 = vadd.f32 %v1184_v42, %v3110_v47  ;;  %v1145_v50 = vpop.f32.mrb[33].mxu0  ;;  %v1186_v51 = vpop.f32.mrb[33].mxu1  ;;  %v2908_v41 = vld [vmem:[%s3072_s3 + $0x80] ss:$16 sps:$4 sm:$0xff]   ;;  %v2914_v42 = vld [vmem:[%s3072_s3 + $0x88] ss:$16 sps:$4 sm:$0xff]  }
 0x517   :  { %v1192_v53 = vadd.f32 %v1145_v50, %v3111_v52  ;;  %v1194_v55 = vadd.f32 %v1186_v51, %v3112_v54  ;;  %v1147_v58 = vpop.f32.mrb[34].mxu0  ;;  %v1188_v59 = vpop.f32.mrb[34].mxu1  ;;  %v2920_v43 = vld [vmem:[%s3072_s3 + $0xa4] ss:$16 sps:$4 sm:$0xff]   ;;  %v3114_v47 = vld [vmem:[#allocation23_spill] sm:$0xff]  ;;  %v3116_v51 = vld [vmem:[#allocation25_spill] sm:$0xff] }
 0x518   :  { %v1195_v60 = vmul.f32 0.5, %v1191_v44  ;;  %v1148_v61 = vpop.f32.mrb[35].mxu0  ;;  %v1189_v63 = vpop.f32.mrb[35].mxu1  ;;  %v1197_v31 = vmul.f32 0.5, %v1193_v48  ;;  %v2926_v44 = vld [vmem:[%s3072_s3 + $0xac] ss:$16 sps:$4 sm:$0xff]  }
 0x519   :  { %v1196_v0 = vmul.f32 0.5, %v1192_v53  ;;  %v3115_v50 = vld [vmem:[#allocation24_spill] sm:$0xff] }
 0x51a   :  { %1996 = vtanh.f32 %v1195_v60 }
 0x51b   :  { %1998 = vtanh.f32 %v1196_v0 }
 0x51c   :  { %2000 = vtanh.f32 %v1194_v55 }
 0x51d   :  { %2002 = vtanh.f32 %v1197_v31 }
 0x524   :  { %v1997_v22 = vpop.eup %1996 }
 0x525   :  { %v1201_v24 = vmul.f32 0.5, %v1997_v22  ;;  %v1999_v25 = vpop.eup %1998 }
 0x526   :  { %v1202_v27 = vmul.f32 0.5, %v1999_v25  ;;  %v2001_v3 = vpop.eup %2000 }
 0x527   :  { %v1204_v26 = vadd.f32 0.5, %v1201_v24  ;;  %v2003_v35 = vpop.eup %2002 }
 0x528   :  { %v1205_v28 = vadd.f32 0.5, %v1202_v27  ;;  %v1203_v34 = vmul.f32 0.5, %v2003_v35  ;;  %v2065_v35 = vld [vmem:[%s3072_s3 + $0xcc] ss:$16 sps:$4 sm:$0xff]  }
 0x529   :  { %v1209_v29 = vmul.f32 %v2001_v3, %v1204_v26 }
 0x52a   :  { %v1208_v46 = vmul.f32 %v1205_v28, %v2752_v17  ;;  %v1206_v16 = vadd.f32 0.5, %v1203_v34  ;;  %v2866_v17 = vld [vmem:[%s3072_s3 + $0x48] ss:$16 sps:$4 sm:$0xff]   ;;  %v2066_v34 = vld [vmem:[%s3072_s3 + $0xc0] ss:$16 sps:$4 sm:$0xff]  }
 0x52c   :  { %v2804_v32 = vadd.f32 %v1209_v29, %v1208_v46  ;;  %v2063_v46 = vld [vmem:[%s3072_s3 + $0xa8] ss:$16 sps:$4 sm:$0xff]  }
 0x52e   :  { %2004 = vtanh.f32 %v2804_v32 }
 0x538   :  { %v2005_v56 = vpop.eup %2004 }
 0x539   :  { %v1212_v36 = vmul.f32 %v2005_v56, %v1206_v16  ;;  %v2067_v16 = vld [vmem:[%s3072_s3 + $0xc8] ss:$16 sps:$4 sm:$0xff]   ;;  %v2068_v56 = vld [vmem:[%s3072_s3 + $0xe4] ss:$16 sps:$4 sm:$0xff]  }
 0x53b   :  { %v1220_v37 = vpack.c.bf16 %v1212_v36, %v1212_v36  ;;  %v2069_v36 = vld [vmem:[%s3072_s3 + $0xec] ss:$16 sps:$4 sm:$0xff]  }
 0x53d   :  { %1254 = vmatmul.mubr.bf16.vlgmr.msra.gmra.mrb[36].mxu0 %v1220_v37  ;;  %1295 = vmatmul.mubr.bf16.vlgmr.msra.gmra.mrb[36].mxu1 %v1220_v37  ;;  %v2070_v37 = vld [vmem:[%s3072_s3 + $0xe0] ss:$16 sps:$4 sm:$0xff]  }
 0x53e   :  { %1334 = vmatpush1.bf16.msra.mxu0 %v2810_v18  ;;  %1375 = vmatpush1.bf16.msra.mxu1 %v2816_v62 }
 0x53f   :  { %1335 = vmatprep.subr.bf16.mxu0 %v2822_v38  ;;  %1376 = vmatprep.subr.bf16.mxu1 %v2828_v20 }
 0x540   :  { %1365 = vmatprep.mubr.bf16.mxu0 %v3103_v49  ;;  %1406 = vmatprep.mubr.bf16.mxu1 %v3103_v49 }
 0x542   :  { %1336 = vmatpush1.bf16.msra.mxu0 %v2836_v5  ;;  %1377 = vmatpush1.bf16.msra.mxu1 %v2842_v45 }
 0x543   :  { %1337 = vmatprep.subr.bf16.mxu0 %v2848_v19  ;;  %1378 = vmatprep.subr.bf16.mxu1 %v2854_v30 }
 0x546   :  { %1338 = vmatpush1.bf16.msra.mxu0 %v2860_v15  ;;  %1379 = vmatpush1.bf16.msra.mxu1 %v2866_v17 }
 0x547   :  { %1339 = vmatprep.subr.bf16.mxu0 %v2872_v21  ;;  %1380 = vmatprep.subr.bf16.mxu1 %v2878_v8 }
 0x54a   :  { %1340 = vmatpush1.bf16.msra.mxu0 %v2884_v33  ;;  %1381 = vmatpush1.bf16.msra.mxu1 %v2890_v4 }
 0x54b   :  { %1341 = vmatprep.subr.bf16.mxu0 %v2896_v57  ;;  %1382 = vmatprep.subr.bf16.mxu1 %v2902_v23 }
 0x54e   :  { %1342 = vmatpush1.bf16.msra.mxu0 %v2908_v41  ;;  %1383 = vmatpush1.bf16.msra.mxu1 %v2914_v42 }
 0x54f   :  { %1343 = vmatprep.subr.bf16.mxu0 %v2920_v43  ;;  %1384 = vmatprep.subr.bf16.mxu1 %v2926_v44 }
 0x552   :  { %1344 = vmatpush1.bf16.msra.mxu0 %v2437_v1  ;;  %1385 = vmatpush1.bf16.msra.mxu1 %v2444_v2 }
 0x553   :  { %1345 = vmatprep.subr.bf16.mxu0 %v2451_v6  ;;  %1386 = vmatprep.subr.bf16.mxu1 %v2456_v7  ;;  %v3113_v6 = vld [vmem:[#allocation22_spill] sm:$0xff] }
 0x556   :  { %1346 = vmatpush1.bf16.msra.mxu0 %v2465_v9  ;;  %1387 = vmatpush1.bf16.msra.mxu1 %v2470_v10 }
 0x557   :  { %1347 = vmatprep.subr.bf16.mxu0 %v2477_v11  ;;  %1388 = vmatprep.subr.bf16.mxu1 %v2482_v12 }
 0x55a   :  { %1348 = vmatpush1.bf16.msra.mxu0 %v2489_v13  ;;  %1389 = vmatpush1.bf16.msra.mxu1 %v2494_v14 }
 0x55b   :  { %1445 = vmatprep.subr.bf16.mxu0 %v2790_v39  ;;  %1486 = vmatprep.subr.bf16.mxu1 %v2796_v40 }
 0x610   :  { %v1255_v1 = vpop.f32.mrb[36].mxu0  ;;  %v1296_v2 = vpop.f32.mrb[36].mxu1 }
 0x611   :  { %v1303_v7 = vadd.f32 %v1255_v1, %v3113_v6  ;;  %v1305_v9 = vadd.f32 %v1296_v2, %v3114_v47  ;;  %v1257_v48 = vpop.f32.mrb[37].mxu0  ;;  %v1298_v10 = vpop.f32.mrb[37].mxu1 }
 0x612   :  { %v1304_v11 = vadd.f32 %v1257_v48, %v3115_v50  ;;  %v1306_v12 = vadd.f32 %v1298_v10, %v3116_v51  ;;  %v1259_v52 = vpop.f32.mrb[38].mxu0  ;;  %v1300_v13 = vpop.f32.mrb[38].mxu1 }
 0x613   :  { %v1307_v53 = vmul.f32 0.5, %v1303_v7  ;;  %v1260_v14 = vpop.f32.mrb[39].mxu0  ;;  %v1301_v54 = vpop.f32.mrb[39].mxu1  ;;  %v1309_v40 = vmul.f32 0.5, %v1305_v9 }
 0x614   :  { %v1308_v39 = vmul.f32 0.5, %v1304_v11  ;;  %v1948_v54 = vld [vmem:[%s3074_s5] sm:$0xff]  }
 0x615   :  { %2006 = vtanh.f32 %v1307_v53 }
 0x616   :  { %2008 = vtanh.f32 %v1308_v39  ;;  %v2144_v39 = vmov 0.0  }
 0x617   :  { %2010 = vtanh.f32 %v1306_v12 }
 0x618   :  { %2012 = vtanh.f32 %v1309_v40  ;;  %v1949_v40 = vld [vmem:[%s3074_s5 + $0x8] sm:$0xff]  }
 0x61f   :  { %v2007_v55 = vpop.eup %2006 }
 0x620   :  { %v1313_v58 = vmul.f32 0.5, %v2007_v55  ;;  %v2009_v59 = vpop.eup %2008  ;;  %v1950_v55 = vld [vmem:[%s3074_s5 + $0x10] sm:$0xff]  }
 0x621   :  { %v1314_v61 = vmul.f32 0.5, %v2009_v59  ;;  %v2011_v63 = vpop.eup %2010  ;;  %v1952_v59 = vld [vmem:[%s3074_s5 + $0x20] sm:$0xff]  }
 0x622   :  { %v1316_v60 = vadd.f32 0.5, %v1313_v58  ;;  %v2013_v25 = vpop.eup %2012  ;;  %v1951_v58 = vld [vmem:[%s3074_s5 + $0x18] sm:$0xff]  }
 0x623   :  { %v1317_v0 = vadd.f32 0.5, %v1314_v61  ;;  %v1315_v26 = vmul.f32 0.5, %v2013_v25  ;;  %v1954_v61 = vld [vmem:[%s3074_s5 + $0x30] sm:$0xff]   ;;  %v3122_v25 = vld [vmem:[#allocation31_spill] sm:$0xff] }
 0x624   :  { %v1321_v31 = vmul.f32 %v2011_v63, %v1316_v60  ;;  %v1953_v60 = vld [vmem:[%s3074_s5 + $0x28] sm:$0xff]   ;;  %v1955_v63 = vld [vmem:[%s3074_s5 + $0x38] sm:$0xff]  }
 0x625   :  { %v1320_v22 = vmul.f32 %v1317_v0, %v2804_v32  ;;  %v1318_v27 = vadd.f32 0.5, %v1315_v26  ;;  %v2064_v32 = vld [vmem:[%s3072_s3 + $0xc4] ss:$16 sps:$4 sm:$0xff]  }
 0x627   :  { %v2946_v24 = vadd.f32 %v1321_v31, %v1320_v22  ;;  %v3121_v22 = vld [vmem:[#allocation30_spill] sm:$0xff] }
 0x629   :  { %2014 = vtanh.f32 %v2946_v24 }
 0x633   :  { %v2015_v3 = vpop.eup %2014 }
 0x634   :  { %v1324_v28 = vmul.f32 %v2015_v3, %v1318_v27 }
 0x636   :  { %v1332_v29 = vpack.c.bf16 %v1324_v28, %v1324_v28  ;;  %v3123_v28 = vld [vmem:[#allocation32_spill] sm:$0xff] }
 0x638   :  { %1366 = vmatmul.mubr.bf16.vlgmr.msra.gmra.mrb[40].mxu0 %v1332_v29  ;;  %1407 = vmatmul.mubr.bf16.vlgmr.msra.gmra.mrb[40].mxu1 %v1332_v29 }
 0x639   :  { %1446 = vmatpush1.bf16.msra.mxu0 %v2810_v18  ;;  %1487 = vmatpush1.bf16.msra.mxu1 %v2816_v62  ;;  %v2071_v18 = vld [vmem:[%s3072_s3 + $0xe8] ss:$16 sps:$4 sm:$0xff]  }
 0x63a   :  { %1447 = vmatprep.subr.bf16.mxu0 %v2822_v38  ;;  %1488 = vmatprep.subr.bf16.mxu1 %v2828_v20  ;;  %v3117_v20 = vld [vmem:[#allocation26_spill] sm:$0xff] }
 0x63b   :  { %1477 = vmatprep.mubr.bf16.mxu0 %v3103_v49  ;;  %1518 = vmatprep.mubr.bf16.mxu1 %v3103_v49  ;;  %v2062_v49 = vld [vmem:[%s3072_s3 + $0xa0] ss:$16 sps:$4 sm:$0xff]  }
 0x63d   :  { %1448 = vmatpush1.bf16.msra.mxu0 %v2836_v5  ;;  %1489 = vmatpush1.bf16.msra.mxu1 %v2842_v45  ;;  %v3118_v45 = vld [vmem:[#allocation27_spill] sm:$0xff] }
 0x63e   :  { %1449 = vmatprep.subr.bf16.mxu0 %v2848_v19  ;;  %1490 = vmatprep.subr.bf16.mxu1 %v2854_v30 }
 0x641   :  { %1450 = vmatpush1.bf16.msra.mxu0 %v2860_v15  ;;  %1491 = vmatpush1.bf16.msra.mxu1 %v2866_v17  ;;  %v3119_v17 = vld [vmem:[#allocation28_spill] sm:$0xff] }
 0x642   :  { %1451 = vmatprep.subr.bf16.mxu0 %v2872_v21  ;;  %1492 = vmatprep.subr.bf16.mxu1 %v2878_v8  ;;  %v3120_v8 = vld [vmem:[#allocation29_spill] sm:$0xff] }
 0x645   :  { %1452 = vmatpush1.bf16.msra.mxu0 %v2884_v33  ;;  %1493 = vmatpush1.bf16.msra.mxu1 %v2890_v4 }
 0x646   :  { %1453 = vmatprep.subr.bf16.mxu0 %v2896_v57  ;;  %1494 = vmatprep.subr.bf16.mxu1 %v2902_v23 }
 0x649   :  { %1454 = vmatpush1.bf16.msra.mxu0 %v2908_v41  ;;  %1495 = vmatpush1.bf16.msra.mxu1 %v2914_v42 }
 0x64a   :  { %1455 = vmatprep.subr.bf16.mxu0 %v2920_v43  ;;  %1496 = vmatprep.subr.bf16.mxu1 %v2926_v44 }
 0x64d   :  { %1456 = vmatpush1.bf16.msra.mxu0 %v2062_v49  ;;  %1497 = vmatpush1.bf16.msra.mxu1 %v2063_v46  ;;  %v3124_v49 = vld [vmem:[#allocation33_spill] sm:$0xff] }
 0x64e   :  { %1457 = vmatprep.subr.bf16.mxu0 %v2064_v32  ;;  %1498 = vmatprep.subr.bf16.mxu1 %v2065_v35 }
 0x651   :  { %1458 = vmatpush1.bf16.msra.mxu0 %v2066_v34  ;;  %1499 = vmatpush1.bf16.msra.mxu1 %v2067_v16 }
 0x652   :  { %1459 = vmatprep.subr.bf16.mxu0 %v2068_v56  ;;  %1500 = vmatprep.subr.bf16.mxu1 %v2069_v36 }
 0x655   :  { %1460 = vmatpush1.bf16.msra.mxu0 %v2070_v37  ;;  %1501 = vmatpush1.bf16.msra.mxu1 %v2071_v18 }
 0x656   :  { %1818 = vmatprep.subr.bf16.mxu0 %v2144_v39 }
 0x70b   :  { %v1367_v62 = vpop.f32.mrb[40].mxu0  ;;  %v1408_v38 = vpop.f32.mrb[40].mxu1 }
 0x70c   :  { %v1415_v5 = vadd.f32 %v1367_v62, %v3117_v20  ;;  %v1417_v19 = vadd.f32 %v1408_v38, %v3118_v45  ;;  %v1369_v30 = vpop.f32.mrb[41].mxu0  ;;  %v1410_v15 = vpop.f32.mrb[41].mxu1 }
 0x70d   :  { %v1416_v21 = vadd.f32 %v1369_v30, %v3119_v17  ;;  %v1418_v33 = vadd.f32 %v1410_v15, %v3120_v8  ;;  %v1371_v4 = vpop.f32.mrb[42].mxu0  ;;  %v1412_v57 = vpop.f32.mrb[42].mxu1 }
 0x70e   :  { %v1419_v23 = vmul.f32 0.5, %v1415_v5  ;;  %v1372_v41 = vpop.f32.mrb[43].mxu0  ;;  %v1413_v42 = vpop.f32.mrb[43].mxu1  ;;  %v1421_v44 = vmul.f32 0.5, %v1417_v19 }
 0x70f   :  { %v1420_v43 = vmul.f32 0.5, %v1416_v21  ;;  %v1800_v41 = vld [vmem:[%s3075_s6] ss:$0 sm:$0xff]  ;;  %s2146_s6 = smov [#allocation7]  }
 0x710   :  { %2016 = vtanh.f32 %v1419_v23  ;;  %s1699_s15 = sshll.u32 %s2146_s6, 4  ;;  %s1700_s15 = int_to_ptr.vmem [resolvable:$true] %s1699_s15 }
 0x711   :  { %2018 = vtanh.f32 %v1420_v43  ;;  %s2084_s16 = scalar_lea.vmem %s1700_s15, 128  ;;  %p2089_p7 = scmp.lt.s32.totalorder %s1700_s15, %s1700_s15 }
 0x712   :  { %2020 = vtanh.f32 %v1418_v33  ;;  %p2085_p6 = scmp.ne.s32.totalorder %s1700_s15, %s2084_s16  ;;  %p2090_p8 = scmp.lt.s32.totalorder %s2084_s16, %s2084_s16 }
 0x713   :  { %2022 = vtanh.f32 %v1421_v44 }
 0x714   :  { %p2091_p9 = por %p2090_p8, %p2089_p7 }
 0x716   :  { %p2092_p10 = pnand %p2091_p9, %p2085_p6 }
 0x71a   :  { %v2017_v1 = vpop.eup %2016 }
 0x71b   :  { %v1425_v2 = vmul.f32 0.5, %v2017_v1  ;;  %v2019_v6 = vpop.eup %2018 }
 0x71c   :  { %v1426_v47 = vmul.f32 0.5, %v2019_v6  ;;  %v2021_v9 = vpop.eup %2020 }
 0x71d   :  { %v1428_v7 = vadd.f32 0.5, %v1425_v2  ;;  %v2023_v51 = vpop.eup %2022 }
 0x71e   :  { %v1429_v48 = vadd.f32 0.5, %v1426_v47  ;;  %v1427_v12 = vmul.f32 0.5, %v2023_v51  ;;  %v3125_v51 = vlaneseq }
 0x71f   :  { %v1433_v10 = vmul.f32 %v2021_v9, %v1428_v7 }
 0x720   :  { %v1432_v50 = vmul.f32 %v1429_v48, %v2946_v24  ;;  %v1430_v52 = vadd.f32 0.5, %v1427_v12  ;;  %v1678_v12 = vand.u32 127, %v3125_v51 }
 0x722   :  { %v3006_v11 = vadd.f32 %v1433_v10, %v1432_v50  ;;  %v1662_v10 = vld [vmem:[%s3076_s7] sm:$0xff]  ;;  %vm1679_vm1 = vcmp.lt.s32.totalorder %v1678_v12, 24 }
 0x724   :  { %2024 = vtanh.f32 %v3006_v11 }
 0x72e   :  { %v2025_v13 = vpop.eup %2024 }
 0x72f   :  { %v1436_v53 = vmul.f32 %v2025_v13, %v1430_v52 }
 0x731   :  { %v1444_v14 = vpack.c.bf16 %v1436_v53, %v1436_v53 }
 0x733   :  { %1478 = vmatmul.mubr.bf16.vlgmr.msra.gmra.mrb[44].mxu0 %v1444_v14  ;;  %1519 = vmatmul.mubr.bf16.vlgmr.msra.gmra.mrb[44].mxu1 %v1444_v14 }
 0x734   :  { %1819 = vmatpush3.bf16.msra.mxu0 %v1948_v54  ;;  %1834 = vmatprep.mubr.msk.bf16.mxu0 %vm2145_vm0, %v2144_v39 }
 0x735   :  { %1820 = vmatprep.subr.bf16.mxu0 %v2144_v39 }
 0x738   :  { %1821 = vmatpush3.bf16.msra.mxu0 %v1949_v40 }
 0x739   :  { %1822 = vmatprep.subr.bf16.mxu0 %v2144_v39 }
 0x73c   :  { %1823 = vmatpush3.bf16.msra.mxu0 %v1950_v55 }
 0x73d   :  { %1824 = vmatprep.subr.bf16.mxu0 %v2144_v39 }
 0x740   :  { %1825 = vmatpush3.bf16.msra.mxu0 %v1951_v58 }
 0x741   :  { %1826 = vmatprep.subr.bf16.mxu0 %v2144_v39 }
 0x744   :  { %1827 = vmatpush3.bf16.msra.mxu0 %v1952_v59 }
 0x745   :  { %1828 = vmatprep.subr.bf16.mxu0 %v2144_v39 }
 0x748   :  { %1829 = vmatpush3.bf16.msra.mxu0 %v1953_v60 }
 0x749   :  { %1830 = vmatprep.subr.bf16.mxu0 %v2144_v39 }
 0x74c   :  { %1831 = vmatpush3.bf16.msra.mxu0 %v1954_v61 }
 0x74d   :  { %1832 = vmatprep.subr.bf16.mxu0 %v2144_v39 }
 0x750   :  { %1833 = vmatpush3.bf16.msra.mxu0 %v1955_v63 }
 0x806   :  { %v1479_v0 = vpop.f32.mrb[44].mxu0  ;;  %v1520_v31 = vpop.f32.mrb[44].mxu1 }
 0x807   :  { %v1527_v24 = vadd.f32 %v1479_v0, %v3121_v22  ;;  %v1529_v26 = vadd.f32 %v1520_v31, %v3122_v25  ;;  %v1481_v27 = vpop.f32.mrb[45].mxu0  ;;  %v1522_v3 = vpop.f32.mrb[45].mxu1 }
 0x808   :  { %v1528_v29 = vadd.f32 %v1481_v27, %v3123_v28  ;;  %v1530_v46 = vadd.f32 %v1522_v3, %v3124_v49  ;;  %v1483_v32 = vpop.f32.mrb[46].mxu0  ;;  %v1524_v35 = vpop.f32.mrb[46].mxu1 }
 0x809   :  { %v1531_v34 = vmul.f32 0.5, %v1527_v24  ;;  %v1484_v16 = vpop.f32.mrb[47].mxu0  ;;  %v1525_v56 = vpop.f32.mrb[47].mxu1  ;;  %v1533_v37 = vmul.f32 0.5, %v1529_v26 }
 0x80a   :  { %v1532_v36 = vmul.f32 0.5, %v1528_v29 }
 0x80b   :  { %2026 = vtanh.f32 %v1531_v34 }
 0x80c   :  { %2028 = vtanh.f32 %v1532_v36 }
 0x80d   :  { %2030 = vtanh.f32 %v1530_v46 }
 0x80e   :  { %2032 = vtanh.f32 %v1533_v37 }
 0x815   :  { %v2027_v18 = vpop.eup %2026 }
 0x816   :  { %v1537_v62 = vmul.f32 0.5, %v2027_v18  ;;  %v2029_v38 = vpop.eup %2028 }
 0x817   :  { %v1538_v5 = vmul.f32 0.5, %v2029_v38  ;;  %v2031_v45 = vpop.eup %2030 }
 0x818   :  { %v1540_v20 = vadd.f32 0.5, %v1537_v62  ;;  %v2033_v21 = vpop.eup %2032 }
 0x819   :  { %v1541_v19 = vadd.f32 0.5, %v1538_v5  ;;  %v1539_v8 = vmul.f32 0.5, %v2033_v21 }
 0x81a   :  { %v1545_v30 = vmul.f32 %v2031_v45, %v1540_v20 }
 0x81b   :  { %v1544_v15 = vmul.f32 %v1541_v19, %v3006_v11  ;;  %v1542_v33 = vadd.f32 0.5, %v1539_v8 }
 0x81d   :  { %v1546_v17 = vadd.f32 %v1545_v30, %v1544_v15 }
 0x81f   :  { %2034 = vtanh.f32 %v1546_v17 }
 0x829   :  { %v2035_v4 = vpop.eup %2034 }
 0x82a   :  { %v1548_v57 = vmul.f32 %v2035_v4, %v1542_v33 }
 0x82c   :  { %v1549_v23 = vpack.c.bf16 %v1548_v57, %v1548_v57 }
 0x82e   :  { %1835 = vmatmul.mubr.bf16.vlgmr.msra.gmra.mrb[48].mxu0 %v1549_v23 }
 0x901   :  { %v1655_v42 = vpop.f32.mrb[48].mxu0 }
 0x902   :  { %v1656_v43 = vadd.f32 %v1800_v41, %v1655_v42  ;;  %v1836_v44 = vpop.f32.mrb[49].mxu0 }
 0x903   :  { %v1658_v1 = vpop.f32.mrb[50].mxu0 }
 0x904   :  { %v1666_v2 = vand.u32 2147483647, %v1656_v43  ;;  %1661 = vst [vmem:[#allocation7] sm:$0xff] %v1656_v43  ;;  %v1837_v6 = vpop.f32.mrb[51].mxu0  ;;  %v1663_v50 = vmax.f32 %v1656_v43, 0.0  ;;  %v1664_v11 = vmul.f32 %v1662_v10, %v1656_v43 }
 0x906   :  { %v1667_v7 = vsub.f32 0.0, %v1666_v2  ;;  %v1665_v13 = vsub.f32 %v1663_v50, %v1664_v11 }
 0x908   :  { %v1668_v47 = vmul.f32 1.442695, %v1667_v7 }
 0x90a   :  { %2036 = vpow2.f32 %v1668_v47 }
 0x914   :  { %v2037_v9 = vpop.eup %2036 }
 0x915   :  { %v1670_v48 = vadd.f32 1.0, %v2037_v9 }
 0x917   :  { %2038 = vlog2.f32 %v1670_v48 }
 0x921   :  { %v2039_v52 = vpop.eup %2038 }
 0x922   :  { %v1672_v53 = vmul.f32 0.6931472, %v2039_v52 }
 0x924   :  { %v1673_v14 = vadd.f32 %v1672_v53, %v1665_v13 }
 0x926   :  { %v1681_v54 = vsel %vm1679_vm1, %v1673_v14, 0.0 }
 0x927   :  { %1682 = vadd.xlane.f32.xlu0 %v1681_v54 }
 0x928   :  { %2095 = shalt.err (!%p2092_p10)
}
 0x929   :  { %s2096_s17 = scalar_lea.hbm %s3077_s8, 128 }
 0x92a   :  { %p2097_p11 = scmp.ne.s32.totalorder %s3077_s8, %s2096_s17  ;;  %p2100_p12 = scmp.lt.u32.totalorder %s2096_s17, %s3077_s8 }
 0x92c   :  { %p2102_p13 = pnand %p2100_p12, %p2097_p11 }
 0x92e   :  { %2105 = shalt.err (!%p2102_p13)
}
 0x92f   :  { %1702 = dma.vmem_to_hbm [thread:$0]  %s1700_s15, 128, %s3077_s8, [#allocation5]   ;;  %vm1691_vm2 = vcmask 0  }
 0x930   :  { %s2147_s22 = smov [#allocation8]  }
 0x931   :  { %s1709_s23 = sshll.u32 %s2147_s22, 4  ;;  %s1710_s23 = int_to_ptr.vmem [resolvable:$true] %s1709_s23 }
 0x932   :  { %s2106_s24 = scalar_lea.vmem %s1710_s23, 16  ;;  %s2110_s25 = scalar_lea.vmem %s1710_s23, 32 }
 0x933   :  { %p2107_p0 = scmp.ne.s32.totalorder %s1710_s23, %s2106_s24  ;;  %p2111_p1 = scmp.lt.s32.totalorder %s1710_s23, %s1710_s23 }
 0x934   :  { %p2112_p2 = scmp.lt.s32.totalorder %s2110_s25, %s2106_s24 }
 0x936   :  { %p2113_p3 = por %p2112_p2, %p2111_p1 }
 0x938   :  { %p2114_p4 = pnand %p2113_p3, %p2107_p0 }
 0x9b4   :  { %v1683_v39 = vpop.xlane.xlu0 %1682 }
 0x9b5   :  { %v1684_v40 = vrot.slane %v1683_v39, 4 }
 0x9b7   :  { %v1685_v55 = vadd.f32 %v1684_v40, %v1683_v39 }
 0x9b9   :  { %v1686_v58 = vrot.slane %v1685_v55, 2 }
 0x9bb   :  { %v1687_v59 = vadd.f32 %v1686_v58, %v1685_v55 }
 0x9bd   :  { %v1688_v60 = vrot.slane %v1687_v59, 1 }
 0x9bf   :  { %v1689_v61 = vadd.f32 %v1688_v60, %v1687_v59 }
 0x9c1   :  { %v1690_v63 = vmul.f32 0.0052083335, %v1689_v61 }
 0x9c3   :  { %1692 = vst.msk [vmem:[#allocation8] sm:$0x1] %vm1691_vm2, %v1690_v63 }
 0x9c4   :  { %2117 = shalt.err (!%p2114_p4)
}
 0x9c5   :  { %s2118_s1 = scalar_lea.hbm %s3078_s9, 16 }
 0x9c6   :  { %p2119_p5 = scmp.ne.s32.totalorder %s3078_s9, %s2118_s1  ;;  %p2122_p6 = scmp.lt.u32.totalorder %s2118_s1, %s3078_s9 }
 0x9c8   :  { %p2124_p7 = pnand %p2122_p6, %p2119_p5 }
 0x9ca   :  { %2127 = shalt.err (!%p2124_p7)
}
 0x9cb   :  { %1712 = dma.vmem_to_hbm [thread:$0]  %s1710_s23, 16, %s3078_s9, [#allocation9]  }
 0x9cc   :  { %2134 = dma.done.wait [#allocation5], 128  }
 0x9cd   :  { %2135 = vsyncadd [#allocation5], 4294967168 }
 0x9ce   :  { %2136 = dma.done.wait [#allocation9], 16  }
 0x9cf   :  { %2137 = vsyncadd [#allocation9], 4294967280 }
 0x9d0   :  { %1719 = vsyncpa [#allocation5], 1 }
 0x9d1   :  { %1720 = vsyncpa [#allocation9], 1 }
 0x9d2   :  { %1721 = vsyncpa [#allocation6], 1 }

</bundles_post_ra>
